<compile_context>
chip_gen: v7x
topology: tpu7x:2x2x1
jax: 0.10.0
libtpu: 0.0.40
codegen_flags: <defaults>
</compile_context>

<pallas_src>
import functools

import jax
import jax.numpy as jnp
from jax.experimental import pallas as pl
from jax.experimental.pallas import tpu as pltpu


def _round_up(x: int, m: int) -> int:
    return ((x + m - 1) // m) * m


# --------------------------------------------------------------------------
# Kernel 1: tiled neighbor aggregation (+ fused in-degree norm, optional W
# projection) + BatchNorm partial statistics
# --------------------------------------------------------------------------
def _gcn_aggregate_kernel(*refs, tile_k: int, hs_resident: bool,
                          pre_projected: bool):
    if pre_projected:
        a_ref, hs_ref = refs[0], refs[1]
        w_ref = None
        y_ref, psum_ref, psq_ref, acc_ref, deg_ref = refs[2:]
    else:
        a_ref, hs_ref, w_ref = refs[0], refs[1], refs[2]
        y_ref, psum_ref, psq_ref, acc_ref, deg_ref = refs[3:]

    k = pl.program_id(1)

    @pl.when(k == 0)
    def _():
        acc_ref[...] = jnp.zeros_like(acc_ref)
        deg_ref[...] = jnp.zeros_like(deg_ref)

    a_blk = a_ref[...]                                   # (tile_m, tile_k) bf16
    if hs_resident:
        start = pl.multiple_of(k * tile_k, tile_k)
        hs_blk = hs_ref[pl.ds(start, tile_k), :]         # slice of resident hs
    else:
        hs_blk = hs_ref[...]

    # bf16 x bf16 -> f32 MXU accumulate of the neighbor sum.
    acc_ref[...] += jnp.dot(a_blk, hs_blk, preferred_element_type=jnp.float32)
    # Fused in-degree accumulation (exact: 0/1 entries, f32 integer sums).
    deg_ref[...] += jnp.sum(a_blk.astype(jnp.float32), axis=1, keepdims=True)

    @pl.when(k == pl.num_programs(1) - 1)
    def _():
        dstn = jax.lax.rsqrt(jnp.maximum(deg_ref[...], 1.0))   # dst norm
        if pre_projected:
            y = acc_ref[...] * dstn
        else:
            # Projection with W (bf16 MXU operands, f32 acc); the dst-norm row
            # scale commutes through W, so apply it after (fewer VPU muls).
            y = jnp.dot(acc_ref[...].astype(jnp.bfloat16), w_ref[...],
                        preferred_element_type=jnp.float32) * dstn
        y_ref[...] = y
        # Per-row-tile partials for BatchNorm batch statistics (broadcast over
        # 8 sublanes so the partials output stays (8, 128)-tiled).
        s = jnp.sum(y, axis=0, keepdims=True)
        sq = jnp.sum(y * y, axis=0, keepdims=True)
        psum_ref[...] = jnp.broadcast_to(s, psum_ref.shape)
        psq_ref[...] = jnp.broadcast_to(sq, psq_ref.shape)


# --------------------------------------------------------------------------
# Kernel 2: fused affine (BN + bias) -> LeakyReLU -> (dropout p=0) -> residual
# --------------------------------------------------------------------------
def _gcn_epilogue_kernel(*refs, residual: bool, neg_slope: float):
    if residual:
        y_ref, hres_ref, scale_ref, shift_ref, out_ref = refs
    else:
        y_ref, scale_ref, shift_ref, out_ref = refs
        hres_ref = None
    y = y_ref[...] * scale_ref[...] + shift_ref[...]
    y = jnp.where(y >= 0.0, y, neg_slope * y)
    # TODO(synk): stochastic dropout via pltpu.prng_seed + prng_random_bits
    # when dropout probability > 0 (p = 0 is identity, as in the test config).
    if residual:
        y = y + hres_ref[...]
    out_ref[...] = y.astype(out_ref.dtype)


# --------------------------------------------------------------------------
# Wrapper
# --------------------------------------------------------------------------
def gcn_layer(a, h, w, b, gamma, beta, *,
              residual=True, batch_norm=True, dropout_p=0.0,
              eps=1e-5, neg_slope=0.01, hs_resident=None):
    """Dense-adjacency GCN layer forward pass.

    a:     [N, N]    float32 adjacency (A[i, j] = 1 iff edge j -> i)
    h:     [N, Din]  float32 node features
    w:     [Din, Dout];  b / gamma / beta: [1, Dout]
    """
    f32, bf16 = jnp.float32, jnp.bfloat16
    n, din = h.shape
    dout = w.shape[1]
    if din != dout:
        residual = False            # mirrors the PyTorch __init__ behavior
    if dropout_p != 0.0:
        raise NotImplementedError("dropout_p > 0 not implemented")

    din_p = _round_up(din, 128)
    dout_p = _round_up(dout, 128)
    pre_projected = dout_p < din_p          # project first when it narrows

    # --- tiling: big A tiles (HBM-bound stream), >= 2 row tiles for megacore
    if n >= 2048:
        tile_m, tile_k = 1024, 512
    elif n >= 1024:
        tile_m, tile_k = 512, 512
    elif n >= 512:
        tile_m, tile_k = 256, 256
    else:
        tile_m, tile_k = 128, 128
    n_pad = _round_up(n, max(2 * tile_m, tile_k))

    feat_p = dout_p if pre_projected else din_p
    if hs_resident is None:
        hs_resident = (n_pad * feat_p * 2) <= (8 << 20)   # keep hs in VMEM

    # --- VMEM budget (v7x has 64 MiB physical: stay under ~44 MiB)
    def _vmem_est(tm, tk, res):
        a_b = 2 * tm * tk * 2                              # A double-buffer
        hs_b = n_pad * feat_p * 2 if res else 2 * tk * feat_p * 2
        w_b = 0 if pre_projected else 2 * din_p * dout_p * 2
        y_b = 2 * tm * dout_p * 4
        acc_b = tm * feat_p * 4
        deg_b = tm * 128 * 4
        part_b = 2 * 2 * 8 * dout_p * 4
        return a_b + hs_b + w_b + y_b + acc_b + deg_b + part_b

    while _vmem_est(tile_m, tile_k, hs_resident) > (44 << 20):
        if hs_resident:
            hs_resident = False
            continue
        if tile_m > 128:
            tile_m //= 2
            continue
        if tile_k > 128:
            tile_k //= 2
            continue
        break

    num_i = n_pad // tile_m
    num_k = n_pad // tile_k

    # --- build padded operands.  One pass over A for the bf16 cast + pad; the
    #     out-degree reduction reads the (half-width) bf16 copy; the in-degree
    #     is fused into kernel 1.
    a_p = jnp.zeros((n_pad, n_pad), bf16).at[:n, :n].set(a.astype(bf16))
    deg_out = jnp.sum(a_p, axis=0, dtype=f32)[:, None]          # (n_pad, 1)
    src_norm = jax.lax.rsqrt(jnp.maximum(deg_out, 1.0))

    h_p = jnp.zeros((n_pad, din_p), f32).at[:n, :din].set(h.astype(f32))
    w_p = jnp.zeros((din_p, dout_p), bf16).at[:din, :dout].set(w.astype(bf16))
    hs_p = (h_p * src_norm).astype(bf16)                 # fold src norm into h

    if pre_projected:
        # Pre-project so the O(N^2) aggregation runs at width dout_p.
        feat_in = jnp.dot(hs_p, w_p, preferred_element_type=f32).astype(bf16)
    else:
        feat_in = hs_p

    # --- aggregation kernel call
    kernel1 = functools.partial(_gcn_aggregate_kernel, tile_k=tile_k,
                                hs_resident=hs_resident,
                                pre_projected=pre_projected)
    in_specs = [pl.BlockSpec((tile_m, tile_k), lambda i, k: (i, k))]   # A tile
    if hs_resident:
        in_specs.append(pl.BlockSpec((n_pad, feat_p), lambda i, k: (0, 0)))
    else:
        in_specs.append(pl.BlockSpec((tile_k, feat_p), lambda i, k: (k, 0)))
    args = [a_p, feat_in]
    if not pre_projected:
        in_specs.append(pl.BlockSpec((din_p, dout_p), lambda i, k: (0, 0)))
        args.append(w_p)

    feat_reads = 1 if hs_resident else num_i
    flops = 2 * n_pad * n_pad * feat_p
    if not pre_projected:
        flops += 2 * n_pad * din_p * dout_p
    cost = pl.CostEstimate(
        flops=flops, transcendentals=n_pad,
        bytes_accessed=(2 * n_pad * n_pad
                        + 2 * n_pad * feat_p * feat_reads
                        + (0 if pre_projected else 2 * din_p * dout_p)
                        + 4 * n_pad * dout_p
                        + 2 * 4 * 8 * num_i * dout_p))

    y1, psum, psq = pl.pallas_call(
        kernel1,
        out_shape=(
            jax.ShapeDtypeStruct((n_pad, dout_p), f32),       # pre-BN features
            jax.ShapeDtypeStruct((num_i * 8, dout_p), f32),   # per-tile sum
            jax.ShapeDtypeStruct((num_i * 8, dout_p), f32),   # per-tile sumsq
        ),
        grid_spec=pltpu.PrefetchScalarGridSpec(
            num_scalar_prefetch=0,
            grid=(num_i, num_k),
            in_specs=in_specs,
            out_specs=[
                pl.BlockSpec((tile_m, dout_p), lambda i, k: (i, 0)),
                pl.BlockSpec((8, dout_p), lambda i, k: (i, 0)),
                pl.BlockSpec((8, dout_p), lambda i, k: (i, 0)),
            ],
            scratch_shapes=[pltpu.VMEM((tile_m, feat_p), f32),   # accumulator
                            pltpu.VMEM((tile_m, 1), f32)],       # in-degree
        ),
        compiler_params=pltpu.CompilerParams(
            dimension_semantics=("parallel", "arbitrary"),
            vmem_limit_bytes=48 * 1024 * 1024),
        cost_estimate=cost,
    )(*args)

    # --- combine tiny per-tile partials into BN batch stats (each tile's
    #     partial is replicated over 8 sublane rows -> sum all rows * 1/8).
    inv_n = 1.0 / float(n)
    mean1 = (jnp.sum(psum, axis=0, keepdims=True) * (0.125 * inv_n))[:, :dout]
    ex2 = (jnp.sum(psq, axis=0, keepdims=True) * (0.125 * inv_n))[:, :dout]
    var1 = jnp.maximum(ex2 - mean1 * mean1, 0.0)

    if batch_norm:
        # The conv bias shifts the mean and cancels under BN, so everything
        # (bias, mean/var, gamma, beta) folds into one affine scale + shift.
        scale = gamma.astype(f32) * jax.lax.rsqrt(var1 + eps)
        shift = beta.astype(f32) - mean1 * scale
    else:
        scale = jnp.ones((1, dout), f32)
        shift = b.astype(f32)

    scale_p = jnp.zeros((1, dout_p), f32).at[:, :dout].set(scale)
    shift_p = jnp.zeros((1, dout_p), f32).at[:, :dout].set(shift)

    # --- epilogue: lane-dense streaming, y1 aliased to the output buffer
    tile_e = 128
    while (tile_e * 2 <= 1024 and n_pad % (tile_e * 2) == 0
           and n_pad // (tile_e * 2) >= 2
           and (tile_e * 2) * dout_p * 4 <= (2 << 20)):
        tile_e *= 2
    num_e = n_pad // tile_e

    eargs = [y1]
    e_in_specs = [pl.BlockSpec((tile_e, dout_p), lambda i: (i, 0))]
    if residual:
        eargs.append(h_p)                       # din_p == dout_p here
        e_in_specs.append(pl.BlockSpec((tile_e, dout_p), lambda i: (i, 0)))
    eargs += [scale_p, shift_p]
    e_in_specs += [pl.BlockSpec((1, dout_p), lambda i: (0, 0)),
                   pl.BlockSpec((1, dout_p), lambda i: (0, 0))]

    epilogue = functools.partial(_gcn_epilogue_kernel,
                                 residual=residual, neg_slope=neg_slope)
    out_p = pl.pallas_call(
        epilogue,
        out_shape=jax.ShapeDtypeStruct((n_pad, dout_p), f32),
        grid=(num_e,),
        in_specs=e_in_specs,
        out_specs=pl.BlockSpec((tile_e, dout_p), lambda i: (i, 0)),
        input_output_aliases={0: 0},            # reuse y1's buffer for out
        compiler_params=pltpu.CompilerParams(
            dimension_semantics=("parallel",),
            vmem_limit_bytes=48 * 1024 * 1024),
    )(*eargs)

    return out_p[:n, :dout]


# --------------------------------------------------------------------------
# Pure-JAX reference (mirrors the kernel's bf16 MXU-operand quantization and
# the pre-/post-projection choice)
# --------------------------------------------------------------------------
def _reference(a, h, w, b, gamma, beta, residual=True, batch_norm=True,
               eps=1e-5):
    f32, bf16 = jnp.float32, jnp.bfloat16
    din = h.shape[1]
    dout = w.shape[1]
    if din != dout:
        residual = False
    pre = _round_up(dout, 128) < _round_up(din, 128)

    deg_in = jnp.sum(a, axis=1, keepdims=True)
    deg_out = jnp.sum(a, axis=0, keepdims=True).T
    dst = jax.lax.rsqrt(jnp.maximum(deg_in, 1.0))
    src = jax.lax.rsqrt(jnp.maximum(deg_out, 1.0))

    a_q = a.astype(bf16)
    hs_q = (h * src).astype(bf16)
    w_q = w.astype(bf16)
    if pre:
        hw_q = jnp.dot(hs_q, w_q, preferred_element_type=f32).astype(bf16)
        y = jnp.dot(a_q, hw_q, preferred_element_type=f32) * dst + b
    else:
        z = jnp.dot(a_q, hs_q, preferred_element_type=f32)
        y = jnp.dot(z.astype(bf16), w_q, preferred_element_type=f32) * dst + b
    if batch_norm:
        mean = jnp.mean(y, axis=0, keepdims=True)
        var = jnp.mean((y - mean) ** 2, axis=0, keepdims=True)
        y = (y - mean) * jax.lax.rsqrt(var + eps) * gamma + beta
    y = jnp.where(y >= 0.0, y, 0.01 * y)
    if residual:
        y = y + h
    return y


if __name__ == "__main__":
    key = jax.random.PRNGKey(0)

    def make_inputs(k, n, din, dout, p_edge=0.05):
        k_a, k_h, k_w, k_b, k_g, k_be = jax.random.split(k, 6)
        upper = (jax.random.uniform(k_a, (n, n)) < p_edge).astype(jnp.float32)
        adj = jnp.triu(upper, k=1)
        adj = adj + adj.T                          # symmetric, no self-loops
        h = jax.random.normal(k_h, (n, din), dtype=jnp.float32)
        w = (jax.random.normal(k_w, (din, dout), dtype=jnp.float32)
             / jnp.sqrt(jnp.float32(din)))
        b = 0.1 * jax.random.normal(k_b, (1, dout), dtype=jnp.float32)
        gamma = 1.0 + 0.1 * jax.random.normal(k_g, (1, dout), dtype=jnp.float32)
        beta = 0.05 * jax.random.normal(k_be, (1, dout), dtype=jnp.float32)
        return adj, h, w, b, gamma, beta

    k1, k2 = jax.random.split(key)

    # Test 1: square layer (residual active), post-projection, resident hs.
    a, h, w, b, gamma, beta = make_inputs(k1, 200, 64, 64)
    fwd1 = jax.jit(functools.partial(gcn_layer, residual=True, batch_norm=True))
    out1 = jax.block_until_ready(fwd1(a, h, w, b, gamma, beta))
    ref1 = _reference(a, h, w, b, gamma, beta, residual=True, batch_norm=True)
    assert out1.shape == (200, 64)
    err1 = float(jnp.max(jnp.abs(out1 - ref1)))
    assert jnp.allclose(out1, ref1, atol=2e-3, rtol=2e-3), (
        f"test1 mismatch vs reference, max abs err = {err1}")

    # Test 2: narrowing layer (din > dout): pre-projection path, streamed
    # (non-resident) feature tiles, residual auto-disabled.
    a, h, w, b, gamma, beta = make_inputs(k2, 300, 256, 64)
    fwd2 = jax.jit(functools.partial(gcn_layer, residual=True, batch_norm=True,
                                     hs_resident=False))
    out2 = jax.block_until_ready(fwd2(a, h, w, b, gamma, beta))
    ref2 = _reference(a, h, w, b, gamma, beta, residual=True, batch_norm=True)
    assert out2.shape == (300, 64)
    err2 = float(jnp.max(jnp.abs(out2 - ref2)))
    assert jnp.allclose(out2, ref2, atol=2e-3, rtol=2e-3), (
        f"test2 mismatch vs reference, max abs err = {err2}")

    print("KERNEL_OK")
</pallas_src>

<mosaic_0001>
module attributes {stable_mosaic.version = 11 : i64} {
  func.func @_gcn_epilogue_kernel(%arg0: i32, %arg1: memref<128x128xf32, #tpu.memory_space<vmem>>, %arg2: memref<128x128xf32, #tpu.memory_space<vmem>>, %arg3: memref<1x128xf32, #tpu.memory_space<vmem>>, %arg4: memref<1x128xf32, #tpu.memory_space<vmem>>, %arg5: memref<128x128xf32, #tpu.memory_space<vmem>>) attributes {dimension_semantics = [#tpu.dimension_semantics<parallel>], iteration_bounds = array<i64: 2>, scalar_prefetch = 0 : i64, scratch_operands = 0 : i64, tpu.core_type = #tpu.core_type<tc>, window_params = [{transform_indices = @transform_0, window_bounds = array<i64: 128, 128>}, {transform_indices = @transform_1, window_bounds = array<i64: 128, 128>}, {pipeline_mode = #tpu.pipeline_mode<synchronous>, transform_indices = @transform_2, window_bounds = array<i64: 1, 128>}, {pipeline_mode = #tpu.pipeline_mode<synchronous>, transform_indices = @transform_3, window_bounds = array<i64: 1, 128>}, {transform_indices = @transform_4, window_bounds = array<i64: 128, 128>}]} {
    %c0 = arith.constant 0 : index
    %c0_0 = arith.constant 0 : index
    %0 = vector.load %arg1[%c0, %c0_0] : memref<128x128xf32, #tpu.memory_space<vmem>>, vector<128x128xf32>
    %c0_1 = arith.constant 0 : index
    %c0_2 = arith.constant 0 : index
    %1 = vector.load %arg3[%c0_1, %c0_2] : memref<1x128xf32, #tpu.memory_space<vmem>>, vector<1x128xf32>
    %2 = vector.broadcast %1 : vector<1x128xf32> to vector<128x128xf32>
    %3 = arith.mulf %0, %2 : vector<128x128xf32>
    %c0_3 = arith.constant 0 : index
    %c0_4 = arith.constant 0 : index
    %4 = vector.load %arg4[%c0_3, %c0_4] : memref<1x128xf32, #tpu.memory_space<vmem>>, vector<1x128xf32>
    %5 = vector.broadcast %4 : vector<1x128xf32> to vector<128x128xf32>
    %6 = arith.addf %3, %5 : vector<128x128xf32>
    %cst = arith.constant 0.000000e+00 : f32
    %7 = vector.broadcast %cst : f32 to vector<128x128xf32>
    %8 = arith.cmpf oge, %6, %7 : vector<128x128xf32>
    %cst_5 = arith.constant 0.00999999977 : f32
    %9 = vector.broadcast %cst_5 : f32 to vector<128x128xf32>
    %10 = arith.mulf %9, %6 : vector<128x128xf32>
    %11 = arith.select %8, %6, %10 : vector<128x128xi1>, vector<128x128xf32>
    %c0_6 = arith.constant 0 : index
    %c0_7 = arith.constant 0 : index
    %12 = vector.load %arg2[%c0_6, %c0_7] : memref<128x128xf32, #tpu.memory_space<vmem>>, vector<128x128xf32>
    %13 = arith.addf %11, %12 : vector<128x128xf32>
    %c0_8 = arith.constant 0 : index
    %c0_9 = arith.constant 0 : index
    %14 = vector.load %arg5[%c0_8, %c0_9] : memref<128x128xf32, #tpu.memory_space<vmem>>, vector<128x128xf32>
    tpu.vector_store %arg5[%c0_8, %c0_9], %13 {strides = array<i32>} : memref<128x128xf32, #tpu.memory_space<vmem>>, vector<128x128xf32>,
    return
  }
  func.func @transform_0(%arg0: i32) -> (i32, i32) {
    %c0_i32 = arith.constant 0 : i32
    %c0_i32_0 = arith.constant 0 : i32
    return %arg0, %c0_i32 : i32, i32
  }
  func.func @transform_1(%arg0: i32) -> (i32, i32) {
    %c0_i32 = arith.constant 0 : i32
    %c0_i32_0 = arith.constant 0 : i32
    return %arg0, %c0_i32 : i32, i32
  }
  func.func @transform_2(%arg0: i32) -> (i32, i32) {
    %c0_i32 = arith.constant 0 : i32
    %c0_i32_0 = arith.constant 0 : i32
    %c0_i32_1 = arith.constant 0 : i32
    return %c0_i32, %c0_i32_0 : i32, i32
  }
  func.func @transform_3(%arg0: i32) -> (i32, i32) {
    %c0_i32 = arith.constant 0 : i32
    %c0_i32_0 = arith.constant 0 : i32
    %c0_i32_1 = arith.constant 0 : i32
    return %c0_i32, %c0_i32_0 : i32, i32
  }
  func.func @transform_4(%arg0: i32) -> (i32, i32) {
    %c0_i32 = arith.constant 0 : i32
    %c0_i32_0 = arith.constant 0 : i32
    return %arg0, %c0_i32 : i32, i32
  }
}

module attributes {stable_mosaic.version = 11 : i64} {
  func.func @_gcn_aggregate_kernel(%arg0: i32, %arg1: i32, %arg2: memref<128x128xbf16, #tpu.memory_space<vmem>>, %arg3: memref<256x128xbf16, #tpu.memory_space<vmem>>, %arg4: memref<128x128xbf16, #tpu.memory_space<vmem>>, %arg5: memref<128x128xf32, #tpu.memory_space<vmem>>, %arg6: memref<8x128xf32, #tpu.memory_space<vmem>>, %arg7: memref<8x128xf32, #tpu.memory_space<vmem>>, %arg8: memref<128x128xf32, #tpu.memory_space<vmem>>, %arg9: memref<128x1xf32, #tpu.memory_space<vmem>>) attributes {dimension_semantics = [#tpu.dimension_semantics<parallel>, #tpu.dimension_semantics<arbitrary>], iteration_bounds = array<i64: 2, 2>, scalar_prefetch = 0 : i64, scratch_operands = 2 : i64, tpu.core_type = #tpu.core_type<tc>, window_params = [{transform_indices = @transform_0, window_bounds = array<i64: 128, 128>}, {pipeline_mode = #tpu.pipeline_mode<synchronous>, transform_indices = @transform_1, window_bounds = array<i64: 256, 128>}, {pipeline_mode = #tpu.pipeline_mode<synchronous>, transform_indices = @transform_2, window_bounds = array<i64: 128, 128>}, {transform_indices = @transform_3, window_bounds = array<i64: 128, 128>}, {transform_indices = @transform_4, window_bounds = array<i64: 8, 128>}, {transform_indices = @transform_5, window_bounds = array<i64: 8, 128>}]} {
    %c0_i32 = arith.constant 0 : i32
    %0 = arith.cmpi eq, %arg1, %c0_i32 : i32
    %1 = arith.extui %0 : i1 to i32
    %c0_i32_0 = arith.constant 0 : i32
    %2 = arith.cmpi ne, %1, %c0_i32_0 : i32
    scf.if %2 {
      %cst_13 = arith.constant 0.000000e+00 : f32
      %21 = vector.broadcast %cst_13 : f32 to vector<128x128xf32>
      %c0_14 = arith.constant 0 : index
      %c0_15 = arith.constant 0 : index
      %22 = vector.load %arg8[%c0_14, %c0_15] : memref<128x128xf32, #tpu.memory_space<vmem>>, vector<128x128xf32>
      tpu.vector_store %arg8[%c0_14, %c0_15], %21 {strides = array<i32>} : memref<128x128xf32, #tpu.memory_space<vmem>>, vector<128x128xf32>,
      %cst_16 = arith.constant 0.000000e+00 : f32
      %23 = vector.broadcast %cst_16 : f32 to vector<128x1xf32>
      %c0_17 = arith.constant 0 : index
      %c0_18 = arith.constant 0 : index
      %24 = vector.load %arg9[%c0_17, %c0_18] : memref<128x1xf32, #tpu.memory_space<vmem>>, vector<128x1xf32>
      tpu.vector_store %arg9[%c0_17, %c0_18], %23 {strides = array<i32>} : memref<128x1xf32, #tpu.memory_space<vmem>>, vector<128x1xf32>,
    } else {
    }
    %c0 = arith.constant 0 : index
    %c0_1 = arith.constant 0 : index
    %3 = vector.load %arg2[%c0, %c0_1] : memref<128x128xbf16, #tpu.memory_space<vmem>>, vector<128x128xbf16>
    %c128_i32 = arith.constant 128 : i32
    %4 = arith.muli %arg1, %c128_i32 : i32
    %5 = tpu.assume_multiple %4, 128 : i32
    %6 = arith.index_cast %5 : i32 to index
    %c0_2 = arith.constant 0 : index
    %7 = vector.load %arg3[%6, %c0_2] : memref<256x128xbf16, #tpu.memory_space<vmem>>, vector<128x128xbf16>
    %c0_3 = arith.constant 0 : index
    %c0_4 = arith.constant 0 : index
    %8 = vector.load %arg8[%c0_3, %c0_4] : memref<128x128xf32, #tpu.memory_space<vmem>>, vector<128x128xf32>
    %cst = arith.constant dense<0.000000e+00> : vector<128x128xf32>
    %9 = tpu.matmul %3, %7, %cst {dimension_numbers = #tpu.dot_dimension_numbers<[1], [0], [0], [1], [0, 0, 1, 1], [], []>} : vector<128x128xbf16>, vector<128x128xbf16>, vector<128x128xf32> -> vector<128x128xf32>
    %10 = arith.addf %8, %9 : vector<128x128xf32>
    %c0_5 = arith.constant 0 : index
    %c0_6 = arith.constant 0 : index
    %11 = vector.load %arg8[%c0_5, %c0_6] : memref<128x128xf32, #tpu.memory_space<vmem>>, vector<128x128xf32>
    tpu.vector_store %arg8[%c0_5, %c0_6], %10 {strides = array<i32>} : memref<128x128xf32, #tpu.memory_space<vmem>>, vector<128x128xf32>,
    %c0_7 = arith.constant 0 : index
    %c0_8 = arith.constant 0 : index
    %12 = vector.load %arg9[%c0_7, %c0_8] : memref<128x1xf32, #tpu.memory_space<vmem>>, vector<128x1xf32>
    %13 = arith.extf %3 : vector<128x128xbf16> to vector<128x128xf32>
    %cst_9 = arith.constant dense<0.000000e+00> : vector<128xf32>
    %14 = vector.multi_reduction <add>, %13, %cst_9 [1] : vector<128x128xf32> to vector<128xf32>
    %15 = vector.shape_cast %14 : vector<128xf32> to vector<128x1xf32>
    %16 = arith.addf %12, %15 : vector<128x1xf32>
    %c0_10 = arith.constant 0 : index
    %c0_11 = arith.constant 0 : index
    %17 = vector.load %arg9[%c0_10, %c0_11] : memref<128x1xf32, #tpu.memory_space<vmem>>, vector<128x1xf32>
    tpu.vector_store %arg9[%c0_10, %c0_11], %16 {strides = array<i32>} : memref<128x1xf32, #tpu.memory_space<vmem>>, vector<128x1xf32>,
    %c1_i32 = arith.constant 1 : i32
    %18 = arith.cmpi eq, %arg1, %c1_i32 : i32
    %19 = arith.extui %18 : i1 to i32
    %c0_i32_12 = arith.constant 0 : i32
    %20 = arith.cmpi ne, %19, %c0_i32_12 : i32
    scf.if %20 {
      %c0_13 = arith.constant 0 : index
      %c0_14 = arith.constant 0 : index
      %21 = vector.load %arg9[%c0_13, %c0_14] : memref<128x1xf32, #tpu.memory_space<vmem>>, vector<128x1xf32>
      %cst_15 = arith.constant 1.000000e+00 : f32
      %22 = vector.broadcast %cst_15 : f32 to vector<128x1xf32>
      %23 = arith.maximumf %21, %22 : vector<128x1xf32>
      %24 = math.rsqrt %23 : vector<128x1xf32>
      %c0_16 = arith.constant 0 : index
      %c0_17 = arith.constant 0 : index
      %25 = vector.load %arg8[%c0_16, %c0_17] : memref<128x128xf32, #tpu.memory_space<vmem>>, vector<128x128xf32>
      %26 = arith.truncf %25 : vector<128x128xf32> to vector<128x128xbf16>
      %c0_18 = arith.constant 0 : index
      %c0_19 = arith.constant 0 : index
      %27 = vector.load %arg4[%c0_18, %c0_19] : memref<128x128xbf16, #tpu.memory_space<vmem>>, vector<128x128xbf16>
      %cst_20 = arith.constant dense<0.000000e+00> : vector<128x128xf32>
      %28 = tpu.matmul %26, %27, %cst_20 {dimension_numbers = #tpu.dot_dimension_numbers<[1], [0], [0], [1], [0, 0, 1, 1], [], []>} : vector<128x128xbf16>, vector<128x128xbf16>, vector<128x128xf32> -> vector<128x128xf32>
      %29 = vector.broadcast %24 : vector<128x1xf32> to vector<128x128xf32>
      %30 = arith.mulf %28, %29 : vector<128x128xf32>
      %c0_21 = arith.constant 0 : index
      %c0_22 = arith.constant 0 : index
      %31 = vector.load %arg5[%c0_21, %c0_22] : memref<128x128xf32, #tpu.memory_space<vmem>>, vector<128x128xf32>
      tpu.vector_store %arg5[%c0_21, %c0_22], %30 {strides = array<i32>} : memref<128x128xf32, #tpu.memory_space<vmem>>, vector<128x128xf32>,
      %cst_23 = arith.constant dense<0.000000e+00> : vector<128xf32>
      %32 = vector.multi_reduction <add>, %30, %cst_23 [0] : vector<128x128xf32> to vector<128xf32>
      %33 = vector.shape_cast %32 : vector<128xf32> to vector<1x128xf32>
      %34 = arith.mulf %30, %30 : vector<128x128xf32>
      %cst_24 = arith.constant dense<0.000000e+00> : vector<128xf32>
      %35 = vector.multi_reduction <add>, %34, %cst_24 [0] : vector<128x128xf32> to vector<128xf32>
      %36 = vector.shape_cast %35 : vector<128xf32> to vector<1x128xf32>
      %37 = vector.shape_cast %33 : vector<1x128xf32> to vector<1x128xf32>
      %38 = vector.broadcast %37 : vector<1x128xf32> to vector<8x128xf32>
      %c0_25 = arith.constant 0 : index
      %c0_26 = arith.constant 0 : index
      %39 = vector.load %arg6[%c0_25, %c0_26] : memref<8x128xf32, #tpu.memory_space<vmem>>, vector<8x128xf32>
      tpu.vector_store %arg6[%c0_25, %c0_26], %38 {strides = array<i32>} : memref<8x128xf32, #tpu.memory_space<vmem>>, vector<8x128xf32>,
      %40 = vector.shape_cast %36 : vector<1x128xf32> to vector<1x128xf32>
      %41 = vector.broadcast %40 : vector<1x128xf32> to vector<8x128xf32>
      %c0_27 = arith.constant 0 : index
      %c0_28 = arith.constant 0 : index
      %42 = vector.load %arg7[%c0_27, %c0_28] : memref<8x128xf32, #tpu.memory_space<vmem>>, vector<8x128xf32>
      tpu.vector_store %arg7[%c0_27, %c0_28], %41 {strides = array<i32>} : memref<8x128xf32, #tpu.memory_space<vmem>>, vector<8x128xf32>,
    } else {
    }
    return
  }
  func.func @transform_0(%arg0: i32, %arg1: i32) -> (i32, i32) {
    %c0_i32 = arith.constant 0 : i32
    return %arg0, %arg1 : i32, i32
  }
  func.func @transform_1(%arg0: i32, %arg1: i32) -> (i32, i32) {
    %c0_i32 = arith.constant 0 : i32
    %c0_i32_0 = arith.constant 0 : i32
    %c0_i32_1 = arith.constant 0 : i32
    return %c0_i32, %c0_i32_0 : i32, i32
  }
  func.func @transform_2(%arg0: i32, %arg1: i32) -> (i32, i32) {
    %c0_i32 = arith.constant 0 : i32
    %c0_i32_0 = arith.constant 0 : i32
    %c0_i32_1 = arith.constant 0 : i32
    return %c0_i32, %c0_i32_0 : i32, i32
  }
  func.func @transform_3(%arg0: i32, %arg1: i32) -> (i32, i32) {
    %c0_i32 = arith.constant 0 : i32
    %c0_i32_0 = arith.constant 0 : i32
    return %arg0, %c0_i32 : i32, i32
  }
  func.func @transform_4(%arg0: i32, %arg1: i32) -> (i32, i32) {
    %c0_i32 = arith.constant 0 : i32
    %c0_i32_0 = arith.constant 0 : i32
    return %arg0, %c0_i32 : i32, i32
  }
  func.func @transform_5(%arg0: i32, %arg1: i32) -> (i32, i32) {
    %c0_i32 = arith.constant 0 : i32
    %c0_i32_0 = arith.constant 0 : i32
    return %arg0, %c0_i32 : i32, i32
  }
}

</mosaic_0001>

<bundles_post_ra>
// kernel: gcn_layer.3
= control target key start
LH: loop header
LB: loop body
LE: loop exit
PB: predicated region body
PF: predicated region fallthrough
CT: control target
= control target key end

     0   :  { %s505_s15 = smov 0   ;;  %s606_s0 = inlined_call_operand.vmem [shape: f32[256,128], index: 0, kind: input, shape index: {}, may-alias: {0,4}]   ;;  %s607_s1 = inlined_call_operand.vmem [shape: f32[256,128], index: 1, kind: input, shape index: {}]   ;;  %s608_s2 = inlined_call_operand.vmem [shape: f32[1,128], index: 2, kind: input, shape index: {}]   ;;  %s609_s3 = inlined_call_operand.vmem [shape: f32[1,128], index: 3, kind: input, shape index: {}]   ;;  %s610_s4 = inlined_call_operand.vmem [shape: f32[256,128], index: 4, kind: output, shape index: {}, may-alias: {0,4}]  }
   0x1 LB: > { %s449_s16 = sadd.s32 4294967295, %s478_s15   ;;  %p453_p0 = scmp.ge.s32.totalorder %s478_s15, 1  ;;  %s478_s15 = sphi %s505_s15, %s14_s15  }
   0x2   : > { %p174_p1 = scmp.lt.s32.totalorder %s478_s15, 3 }
   0x4   : > { %p175_p2 = pnand %p453_p0, %p174_p1 }
   0x5   : > { %s454_s17 = sshll.u32 (!%p175_p2), %s449_s16, 4  ;;  %v460_v0 = vld [vmem:[%s608_s2] ss:$0 sm:$0xff] (!%p175_p2) }
   0x6   : > { %178 = sbr.rel (%p175_p2) target bundleno = 48 (0x30), region = 36  ;;  %p206_p3 = scmp.lt.s32.totalorder (!%p175_p2), %s454_s17, 31  ;;  %v461_v1 = vld [vmem:[%s609_s3] ss:$0 sm:$0xff] (!%p175_p2) }
   0xd   : > { %s612_s17 = smov (!%p206_p3, %s454_s17), 31 }
   0xe   : > { %s513_s18 = sshll.u32 %s612_s17, 3 }
   0xf   : > { %s522_s23 = scalar_lea.vmem %s606_s0, %s513_s18  ;;  %s547_s28 = scalar_lea.vmem %s607_s1, %s513_s18 }
  0x10   : > { %v223_v2 = vld [vmem:[%s522_s23] sm:$0xff]  ;;  %v224_v3 = vld [vmem:[%s522_s23 + $0x8] sm:$0xff]  ;;  %v225_v4 = vld [vmem:[%s522_s23 + $0x10] sm:$0xff]  ;;  %s569_s5 = scalar_lea.vmem %s610_s4, %s513_s18 }
  0x11   : > { %v226_v5 = vld [vmem:[%s522_s23 + $0x18] sm:$0xff]  ;;  %v227_v6 = vld [vmem:[%s522_s23 + $0x20] sm:$0xff]  ;;  %v228_v7 = vld [vmem:[%s522_s23 + $0x28] sm:$0xff]  ;;  %v246_v8 = vmul.f32 %v460_v0, %v223_v2  ;;  %v247_v9 = vmul.f32 %v460_v0, %v224_v3  ;;  %v248_v10 = vmul.f32 %v460_v0, %v225_v4 }
  0x12   : > { %v229_v11 = vld [vmem:[%s522_s23 + $0x30] sm:$0xff]  ;;  %v230_v12 = vld [vmem:[%s522_s23 + $0x38] sm:$0xff]  ;;  %v231_v13 = vld [vmem:[%s522_s23 + $0x40] sm:$0xff]  ;;  %v249_v14 = vmul.f32 %v460_v0, %v226_v5  ;;  %v250_v15 = vmul.f32 %v460_v0, %v227_v6  ;;  %v251_v16 = vmul.f32 %v460_v0, %v228_v7 }
  0x13   : > { %v232_v17 = vld [vmem:[%s522_s23 + $0x48] sm:$0xff]  ;;  %v233_v18 = vld [vmem:[%s522_s23 + $0x50] sm:$0xff]  ;;  %v234_v19 = vld [vmem:[%s522_s23 + $0x58] sm:$0xff]  ;;  %v252_v20 = vmul.f32 %v460_v0, %v229_v11  ;;  %v253_v21 = vmul.f32 %v460_v0, %v230_v12  ;;  %v254_v22 = vmul.f32 %v460_v0, %v231_v13  ;;  %v269_v23 = vadd.f32 %v461_v1, %v246_v8 }
  0x14   : > { %v235_v24 = vld [vmem:[%s522_s23 + $0x60] sm:$0xff]  ;;  %v236_v25 = vld [vmem:[%s522_s23 + $0x68] sm:$0xff]  ;;  %v237_v26 = vld [vmem:[%s522_s23 + $0x70] sm:$0xff]  ;;  %v255_v27 = vmul.f32 %v460_v0, %v232_v17  ;;  %v256_v28 = vmul.f32 %v460_v0, %v233_v18  ;;  %v257_v29 = vmul.f32 %v460_v0, %v234_v19  ;;  %v270_v30 = vadd.f32 %v461_v1, %v247_v9 }
  0x15   : > { %v238_v31 = vld [vmem:[%s522_s23 + $0x78] sm:$0xff]  ;;  %v258_v32 = vmul.f32 %v460_v0, %v235_v24  ;;  %v259_v33 = vmul.f32 %v460_v0, %v236_v25  ;;  %v260_v34 = vmul.f32 %v460_v0, %v237_v26  ;;  %v271_v35 = vadd.f32 %v461_v1, %v248_v10  ;;  %v333_v63 = vld [vmem:[%s547_s28] sm:$0xff]  ;;  %v334_v4 = vld [vmem:[%s547_s28 + $0x8] sm:$0xff] }
  0x16   : > { %v261_v36 = vmul.f32 %v460_v0, %v238_v31  ;;  %v272_v37 = vadd.f32 %v461_v1, %v249_v14  ;;  %v273_v38 = vadd.f32 %v461_v1, %v250_v15  ;;  %v274_v39 = vadd.f32 %v461_v1, %v251_v16  ;;  %v335_v9 = vld [vmem:[%s547_s28 + $0x10] sm:$0xff]  ;;  %v336_v10 = vld [vmem:[%s547_s28 + $0x18] sm:$0xff]  ;;  %v337_v15 = vld [vmem:[%s547_s28 + $0x20] sm:$0xff] }
  0x17   : > { %v275_v40 = vadd.f32 %v461_v1, %v252_v20  ;;  %v276_v41 = vadd.f32 %v461_v1, %v253_v21  ;;  %v277_v42 = vadd.f32 %v461_v1, %v254_v22  ;;  %v278_v43 = vadd.f32 %v461_v1, %v255_v27  ;;  %v338_v16 = vld [vmem:[%s547_s28 + $0x28] sm:$0xff]  ;;  %v339_v17 = vld [vmem:[%s547_s28 + $0x30] sm:$0xff]  ;;  %v340_v22 = vld [vmem:[%s547_s28 + $0x38] sm:$0xff] }
  0x18   : > { %v279_v44 = vadd.f32 %v461_v1, %v256_v28  ;;  %v280_v45 = vadd.f32 %v461_v1, %v257_v29  ;;  %v281_v46 = vadd.f32 %v461_v1, %v258_v32  ;;  %v282_v47 = vadd.f32 %v461_v1, %v259_v33  ;;  %v342_v24 = vld [vmem:[%s547_s28 + $0x48] sm:$0xff]  ;;  %v343_v28 = vld [vmem:[%s547_s28 + $0x50] sm:$0xff]  ;;  %v344_v29 = vld [vmem:[%s547_s28 + $0x58] sm:$0xff] }
  0x19   : > { %v283_v48 = vadd.f32 %v461_v1, %v260_v34  ;;  %v284_v49 = vadd.f32 %v461_v1, %v261_v36  ;;  %vm285_vm0 = vcmp.ge.f32.partialorder %v269_v23, 0.0  ;;  %vm286_vm1 = vcmp.ge.f32.partialorder %v270_v30, 0.0  ;;  %v346_v32 = vld [vmem:[%s547_s28 + $0x68] sm:$0xff]  ;;  %v347_v33 = vld [vmem:[%s547_s28 + $0x70] sm:$0xff]  ;;  %v348_v34 = vld [vmem:[%s547_s28 + $0x78] sm:$0xff] }
  0x1a   : > { %vm287_vm2 = vcmp.ge.f32.partialorder %v271_v35, 0.0  ;;  %vm288_vm3 = vcmp.ge.f32.partialorder %v272_v37, 0.0  ;;  %vm289_vm4 = vcmp.ge.f32.partialorder %v273_v38, 0.0  ;;  %vm290_vm5 = vcmp.ge.f32.partialorder %v274_v39, 0.0 }
  0x1b   : > { %vm291_vm6 = vcmp.ge.f32.partialorder %v275_v40, 0.0  ;;  %vm292_vm7 = vcmp.ge.f32.partialorder %v276_v41, 0.0  ;;  %vm293_vm8 = vcmp.ge.f32.partialorder %v277_v42, 0.0  ;;  %vm294_vm9 = vcmp.ge.f32.partialorder %v278_v43, 0.0 }
  0x1c   : > { %vm295_vm10 = vcmp.ge.f32.partialorder %v279_v44, 0.0  ;;  %vm296_vm11 = vcmp.ge.f32.partialorder %v280_v45, 0.0  ;;  %vm297_vm12 = vcmp.ge.f32.partialorder %v281_v46, 0.0  ;;  %vm298_vm13 = vcmp.ge.f32.partialorder %v282_v47, 0.0 }
  0x1d   : > { %vm299_vm14 = vcmp.ge.f32.partialorder %v283_v48, 0.0  ;;  %vm300_vm15 = vcmp.ge.f32.partialorder %v284_v49, 0.0  ;;  %v301_v50 = vmul.f32 0.01, %v269_v23  ;;  %v302_v51 = vmul.f32 0.01, %v270_v30 }
  0x1e   : > { %v303_v52 = vmul.f32 0.01, %v271_v35  ;;  %v304_v53 = vmul.f32 0.01, %v272_v37  ;;  %v305_v54 = vmul.f32 0.01, %v273_v38 }
  0x1f   : > { %v306_v55 = vmul.f32 0.01, %v274_v39  ;;  %v307_v56 = vmul.f32 0.01, %v275_v40  ;;  %v308_v57 = vmul.f32 0.01, %v276_v41  ;;  %v317_v58 = vsel %vm285_vm0, %v269_v23, %v301_v50 }
  0x20   : > { %v309_v59 = vmul.f32 0.01, %v277_v42  ;;  %v310_v60 = vmul.f32 0.01, %v278_v43  ;;  %v311_v61 = vmul.f32 0.01, %v279_v44  ;;  %v318_v62 = vsel %vm286_vm1, %v270_v30, %v302_v51 }
  0x21   : > { %v312_v0 = vmul.f32 0.01, %v280_v45  ;;  %v313_v1 = vmul.f32 0.01, %v281_v46  ;;  %v314_v2 = vmul.f32 0.01, %v282_v47  ;;  %v319_v3 = vsel %vm287_vm2, %v271_v35, %v303_v52 }
  0x22   : > { %v315_v5 = vmul.f32 0.01, %v283_v48  ;;  %v316_v6 = vmul.f32 0.01, %v284_v49  ;;  %v320_v7 = vsel %vm288_vm3, %v272_v37, %v304_v53  ;;  %v321_v8 = vsel %vm289_vm4, %v273_v38, %v305_v54  ;;  %v341_v23 = vld [vmem:[%s547_s28 + $0x40] sm:$0xff] }
  0x23   : > { %v322_v11 = vsel %vm290_vm5, %v274_v39, %v306_v55  ;;  %v323_v12 = vsel %vm291_vm6, %v275_v40, %v307_v56  ;;  %v324_v13 = vsel %vm292_vm7, %v276_v41, %v308_v57  ;;  %v325_v14 = vsel %vm293_vm8, %v277_v42, %v309_v59  ;;  %v345_v30 = vld [vmem:[%s547_s28 + $0x60] sm:$0xff] }
  0x24   : > { %v326_v18 = vsel %vm294_vm9, %v278_v43, %v310_v60  ;;  %v327_v19 = vsel %vm295_vm10, %v279_v44, %v311_v61  ;;  %v328_v20 = vsel %vm296_vm11, %v280_v45, %v312_v0  ;;  %v329_v21 = vsel %vm297_vm12, %v281_v46, %v313_v1 }
  0x25   : > { %v330_v25 = vsel %vm298_vm13, %v282_v47, %v314_v2  ;;  %v331_v26 = vsel %vm299_vm14, %v283_v48, %v315_v5  ;;  %v332_v27 = vsel %vm300_vm15, %v284_v49, %v316_v6  ;;  %v349_v31 = vadd.f32 %v333_v63, %v317_v58 }
  0x26   : > { %v350_v35 = vadd.f32 %v334_v4, %v318_v62  ;;  %v351_v36 = vadd.f32 %v335_v9, %v319_v3  ;;  %v352_v37 = vadd.f32 %v336_v10, %v320_v7  ;;  %v353_v38 = vadd.f32 %v337_v15, %v321_v8 }
  0x27   : > { %v354_v39 = vadd.f32 %v338_v16, %v322_v11  ;;  %v355_v40 = vadd.f32 %v339_v17, %v323_v12  ;;  %v356_v41 = vadd.f32 %v340_v22, %v324_v13  ;;  %v357_v42 = vadd.f32 %v341_v23, %v325_v14  ;;  %365 = vst [vmem:[%s569_s5] sm:$0xff] %v349_v31 }
  0x28   : > { %v358_v43 = vadd.f32 %v342_v24, %v326_v18  ;;  %v359_v44 = vadd.f32 %v343_v28, %v327_v19  ;;  %v360_v45 = vadd.f32 %v344_v29, %v328_v20  ;;  %v361_v46 = vadd.f32 %v345_v30, %v329_v21  ;;  %366 = vst [vmem:[%s569_s5 + $0x8] sm:$0xff] %v350_v35 }
  0x29   : > { %367 = vst [vmem:[%s569_s5 + $0x10] sm:$0xff] %v351_v36  ;;  %368 = vst [vmem:[%s569_s5 + $0x18] sm:$0xff] %v352_v37  ;;  %v362_v47 = vadd.f32 %v346_v32, %v330_v25  ;;  %v363_v48 = vadd.f32 %v347_v33, %v331_v26  ;;  %v364_v49 = vadd.f32 %v348_v34, %v332_v27 }
  0x2a   : > { %369 = vst [vmem:[%s569_s5 + $0x20] sm:$0xff] %v353_v38  ;;  %370 = vst [vmem:[%s569_s5 + $0x28] sm:$0xff] %v354_v39 }
  0x2b   : > { %371 = vst [vmem:[%s569_s5 + $0x30] sm:$0xff] %v355_v40  ;;  %372 = vst [vmem:[%s569_s5 + $0x38] sm:$0xff] %v356_v41 }
  0x2c   : > { %373 = vst [vmem:[%s569_s5 + $0x40] sm:$0xff] %v357_v42  ;;  %374 = vst [vmem:[%s569_s5 + $0x48] sm:$0xff] %v358_v43 }
  0x2d   : > { %375 = vst [vmem:[%s569_s5 + $0x50] sm:$0xff] %v359_v44  ;;  %376 = vst [vmem:[%s569_s5 + $0x58] sm:$0xff] %v360_v45 }
  0x2e   : > { %377 = vst [vmem:[%s569_s5 + $0x60] sm:$0xff] %v361_v46  ;;  %378 = vst [vmem:[%s569_s5 + $0x68] sm:$0xff] %v362_v47 }
  0x2f   : > { %379 = vst [vmem:[%s569_s5 + $0x70] sm:$0xff] %v363_v48  ;;  %380 = vst [vmem:[%s569_s5 + $0x78] sm:$0xff] %v364_v49 }
  0x30 PF: > { %s14_s15 = sadd.s32 1, %s478_s15  }
  0x31   : > { %p11_p4 = scmp.ge.s32.totalorder %s14_s15, 4  }
  0x33   :  { %13 = sbr.rel (!%p11_p4) target bundleno = 1 (0x1), region = 69 }

// kernel: gcn_layer.2
= control target key start
LH: loop header
LB: loop body
LE: loop exit
PB: predicated region body
PF: predicated region fallthrough
CT: control target
= control target key end

     0   :  { %s1713_s18 = smov 0   ;;  %s1715_s19 = smov 0   ;;  %s1964_s0 = inlined_call_operand.vmem [shape: bf16[256,256], index: 0, kind: input, shape index: {}]   ;;  %s1965_s1 = inlined_call_operand.vmem [shape: bf16[256,128], index: 1, kind: input, shape index: {}]   ;;  %s1966_s2 = inlined_call_operand.vmem [shape: bf16[128,128], index: 2, kind: input, shape index: {}]   ;;  %s1967_s3 = inlined_call_operand.vmem [shape: f32[256,128], index: 3, kind: output, shape index: {0}]   ;;  %s1968_s4 = inlined_call_operand.vmem [shape: f32[16,128], index: 4, kind: output, shape index: {1}]   ;;  %s1969_s5 = inlined_call_operand.vmem [shape: f32[16,128], index: 5, kind: output, shape index: {2}]  }
   0x1   :  { %s1717_s20 = smov 0   ;;  %s1719_s21 = smov 0  }
   0x2   :  { %s1721_s22 = smov 0   ;;  %s1723_s23 = smov 0  }
   0x3   :  { %s1725_s24 = smov 0  }
   0x4 LB: > { %s25_s25 = sadd.s32 1, %s1671_s22  ;;  %s28_s26 = sadd.s32 1, %s1675_s23  ;;  %s1679_s24 = sphi %s1725_s24, %s16_s24   ;;  %s1675_s23 = sphi %s1723_s23, %s1975_s23   ;;  %s1671_s22 = sphi %s1721_s22, %s1974_s22   ;;  %s1667_s21 = sphi %s1719_s21, %s1973_s21   ;;  %s1663_s20 = sphi %s1717_s20, %s1972_s20   ;;  %s1659_s19 = sphi %s1715_s19, %s1971_s19   ;;  %s1655_s18 = sphi %s1713_s18, %s1970_s18  }
   0x5   : > { %p26_p0 = scmp.ge.s32.totalorder %s25_s25, 2  ;;  %p44_p1 = scmp.ne.s32.totalorder %s1659_s19, %s1655_s18 }
   0x6   : > { %p45_p2 = scmp.eq.s32.totalorder %s1679_s24, 0  ;;  %s37_s30 = sadd.s32 1, %s1659_s19 }
   0x7   : > { %s1977_s25 = smov (%p26_p0, %s25_s25), 0  ;;  %s1979_s26 = smov (!%p26_p0, %s28_s26), %s1675_s23 }
   0x8   : > { %p46_p3 = por %p45_p2, %p44_p1  ;;  %p30_p4 = scmp.ge.s32.totalorder %s1979_s26, 2 }
   0x9   : > { %s33_s27 = ssub.s32 %s1671_s22, %s1977_s25  ;;  %p1331_p6 = scmp.ge.s32.totalorder %s1679_s24, 4 }
   0xa   : > { %s1981_s26 = smov (%p30_p4, %s1979_s26), 0 }
   0xb   : > { %s32_s28 = ssub.s32 %s1675_s23, %s1981_s26  ;;  %196 = sbr.rel (%p1331_p6) target bundleno = 34 (0x22), region = 24 }
   0xc   : > { %s34_s29 = sor.u32 %s33_s27, %s32_s28 }
   0xd   : > { %p35_p5 = scmp.eq.s32.totalorder %s34_s29, 0 }
   0xf   : > { %s1764_s6 = scalar_select %p35_p5, %s1659_s19, %s37_s30  }
  0x12   : > { %199 = sbr.rel (!%p46_p3) target bundleno = 34 (0x22), region = 28  ;;  %s201_s7 = sand.u32 (%p46_p3), 1, %s1659_s19  }
  0x13   : > { %s1372_s8 = sshll.u32 (%p46_p3), %s1675_s23, 5  ;;  %s1332_s9 = sshll.u32 (%p46_p3), %s201_s7, 6 }
  0x14   : > { %s206_s10 = sadd.s32 (%p46_p3), %s1671_s22, %s1372_s8  ;;  %s203_s15 = scalar_lea.vmem (%p46_p3), [#allocation4], %s1332_s9 }
  0x15   : > { %s1335_s11 = sshll.u32 (%p46_p3), %s206_s10, 2 }
  0x16   : > { %s1773_s14 = scalar_lea.vmem (%p46_p3), %s1964_s0, %s1335_s11 }
  0x17   : > { %v224_v0 = vld [vmem:[%s1773_s14] sm:$0xf] (%p46_p3)  ;;  %v226_v1 = vld [vmem:[%s1773_s14 + $0x8] sm:$0xf] (%p46_p3)  ;;  %v228_v2 = vld [vmem:[%s1773_s14 + $0x10] sm:$0xf] (%p46_p3) }
  0x18   : > { %225 = vst [vmem:[%s203_s15] sm:$0xf] (%p46_p3), %v224_v0  ;;  %227 = vst [vmem:[%s203_s15 + $0x4] sm:$0xf] (%p46_p3), %v226_v1  ;;  %v230_v3 = vld [vmem:[%s1773_s14 + $0x18] sm:$0xf] (%p46_p3) }
  0x19   : > { %229 = vst [vmem:[%s203_s15 + $0x8] sm:$0xf] %v228_v2  ;;  %v232_v4 = vld [vmem:[%s1773_s14 + $0x20] sm:$0xf]  ;;  %v234_v5 = vld [vmem:[%s1773_s14 + $0x28] sm:$0xf] }
  0x1a   : > { %231 = vst [vmem:[%s203_s15 + $0xc] sm:$0xf] %v230_v3  ;;  %233 = vst [vmem:[%s203_s15 + $0x10] sm:$0xf] %v232_v4  ;;  %v236_v6 = vld [vmem:[%s1773_s14 + $0x30] sm:$0xf] }
  0x1b   : > { %235 = vst [vmem:[%s203_s15 + $0x14] sm:$0xf] %v234_v5  ;;  %v238_v7 = vld [vmem:[%s1773_s14 + $0x38] sm:$0xf]  ;;  %v240_v8 = vld [vmem:[%s1773_s14 + $0x40] sm:$0xf] }
  0x1c   : > { %237 = vst [vmem:[%s203_s15 + $0x18] sm:$0xf] %v236_v6  ;;  %239 = vst [vmem:[%s203_s15 + $0x1c] sm:$0xf] %v238_v7  ;;  %v242_v9 = vld [vmem:[%s1773_s14 + $0x48] sm:$0xf] }
  0x1d   : > { %241 = vst [vmem:[%s203_s15 + $0x20] sm:$0xf] %v240_v8  ;;  %v244_v10 = vld [vmem:[%s1773_s14 + $0x50] sm:$0xf]  ;;  %v246_v11 = vld [vmem:[%s1773_s14 + $0x58] sm:$0xf] }
  0x1e   : > { %243 = vst [vmem:[%s203_s15 + $0x24] sm:$0xf] %v242_v9  ;;  %245 = vst [vmem:[%s203_s15 + $0x28] sm:$0xf] %v244_v10  ;;  %v248_v12 = vld [vmem:[%s1773_s14 + $0x60] sm:$0xf] }
  0x1f   : > { %247 = vst [vmem:[%s203_s15 + $0x2c] sm:$0xf] %v246_v11  ;;  %v250_v13 = vld [vmem:[%s1773_s14 + $0x68] sm:$0xf]  ;;  %v252_v14 = vld [vmem:[%s1773_s14 + $0x70] sm:$0xf] }
  0x20   : > { %249 = vst [vmem:[%s203_s15 + $0x30] sm:$0xf] %v248_v12  ;;  %251 = vst [vmem:[%s203_s15 + $0x34] sm:$0xf] %v250_v13  ;;  %v254_v15 = vld [vmem:[%s1773_s14 + $0x78] sm:$0xf] }
  0x21   : > { %253 = vst [vmem:[%s203_s15 + $0x38] sm:$0xf] %v252_v14  ;;  %255 = vst [vmem:[%s203_s15 + $0x3c] sm:$0xf] %v254_v15 }
  0x22 PF: > { %p1336_p7 = scmp.ge.s32.totalorder %s1679_s24, 1  ;;  %p309_p8 = scmp.lt.s32.totalorder %s1679_s24, 5 }
  0x24   : > { %p310_p9 = pnand %p1336_p7, %p309_p8 }
  0x25   : > { %s316_s16 = sand.u32 (!%p310_p9), 1, %s1655_s18   ;;  %s1338_s17 = sshll.u32 (!%p310_p9), %s1667_s21, 4 }
  0x26   : > { %313 = sbr.rel (%p310_p9) target bundleno = 591 (0x24f), region = 69  ;;  %s1337_s27 = sshll.u32 (!%p310_p9), %s316_s16, 6 }
  0x27   : > { %p353_p10 = scmp.lt.s32.totalorder (!%p310_p9), %s1338_s17, 31  ;;  %p358_p11 = scmp.lt.s32.totalorder (!%p310_p9), %s1667_s21, 1 }
  0x28   : > { %s1812_s14 = scalar_lea.vmem (!%p310_p9), [#allocation4], %s1337_s27  ;;  %p1342_p12 = scmp.ne.s32.totalorder (!%p310_p9), %s1663_s20, 0 }
  0x2d   : > { %s1983_s17 = smov (!%p353_p10, %s1338_s17), 31  ;;  %s1985_s21 = smov (!%p358_p11, %s1667_s21), 1 }
  0x2e   : > { %s1339_s28 = sshll.u32 %s1983_s17, 3  ;;  %s1340_s8 = sshll.u32 %s1985_s21, 3  ;;  %vm387_vm0 = vcmask (!%p1342_p12), 7168   ;;  %v1681_v16 = vmov (!%p1342_p12), 0.0  }
  0x2f   : > { %s1800_s7 = scalar_lea.vmem %s1967_s3, %s1339_s28  ;;  %s1805_s11 = scalar_lea.vmem %s1968_s4, %s1340_s8  ;;  %371 = vst [vmem:[#allocation2] sm:$0xff] (!%p1342_p12), %v1681_v16  ;;  %372 = vst [vmem:[#allocation2 + $0x8] sm:$0xff] (!%p1342_p12), %v1681_v16 }
  0x30   : > { %s1810_s13 = scalar_lea.vmem %s1969_s5, %s1340_s8  ;;  %370 = sbr.rel (%p1342_p12) target bundleno = 63 (0x3f), region = 77  ;;  %373 = vst [vmem:[#allocation2 + $0x10] sm:$0xff] (!%p1342_p12), %v1681_v16  ;;  %374 = vst [vmem:[#allocation2 + $0x18] sm:$0xff] (!%p1342_p12), %v1681_v16 }
  0x31   : > { %375 = vst [vmem:[#allocation2 + $0x20] sm:$0xff] (!%p1342_p12), %v1681_v16  ;;  %376 = vst [vmem:[#allocation2 + $0x28] sm:$0xff] (!%p1342_p12), %v1681_v16 }
  0x32   : > { %377 = vst [vmem:[#allocation2 + $0x30] sm:$0xff] (!%p1342_p12), %v1681_v16  ;;  %378 = vst [vmem:[#allocation2 + $0x38] sm:$0xff] (!%p1342_p12), %v1681_v16 }
  0x33   : > { %379 = vst [vmem:[#allocation2 + $0x40] sm:$0xff] (!%p1342_p12), %v1681_v16  ;;  %380 = vst [vmem:[#allocation2 + $0x48] sm:$0xff] (!%p1342_p12), %v1681_v16 }
  0x34   : > { %381 = vst [vmem:[#allocation2 + $0x50] sm:$0xff] (!%p1342_p12), %v1681_v16  ;;  %382 = vst [vmem:[#allocation2 + $0x58] sm:$0xff] (!%p1342_p12), %v1681_v16 }
  0x35   : > { %383 = vst [vmem:[#allocation2 + $0x60] sm:$0xff] (!%p1342_p12), %v1681_v16  ;;  %384 = vst [vmem:[#allocation2 + $0x68] sm:$0xff] (!%p1342_p12), %v1681_v16 }
  0x36   : > { %385 = vst [vmem:[#allocation2 + $0x70] sm:$0xff] (!%p1342_p12), %v1681_v16  ;;  %386 = vst [vmem:[#allocation2 + $0x78] sm:$0xff] (!%p1342_p12), %v1681_v16 }
  0x37   : > { %388 = vst.msk [vmem:[#allocation3] sm:$0xff] %vm387_vm0, %v1681_v16  ;;  %389 = vst.msk [vmem:[#allocation3 + $0x8] sm:$0xff] %vm387_vm0, %v1681_v16 }
  0x38   : > { %390 = vst.msk [vmem:[#allocation3 + $0x10] sm:$0xff] %vm387_vm0, %v1681_v16  ;;  %391 = vst.msk [vmem:[#allocation3 + $0x18] sm:$0xff] %vm387_vm0, %v1681_v16 }
  0x39   : > { %392 = vst.msk [vmem:[#allocation3 + $0x20] sm:$0xff] %vm387_vm0, %v1681_v16  ;;  %393 = vst.msk [vmem:[#allocation3 + $0x28] sm:$0xff] %vm387_vm0, %v1681_v16 }
  0x3a   : > { %394 = vst.msk [vmem:[#allocation3 + $0x30] sm:$0xff] %vm387_vm0, %v1681_v16  ;;  %395 = vst.msk [vmem:[#allocation3 + $0x38] sm:$0xff] %vm387_vm0, %v1681_v16 }
  0x3b   : > { %396 = vst.msk [vmem:[#allocation3 + $0x40] sm:$0xff] %vm387_vm0, %v1681_v16  ;;  %397 = vst.msk [vmem:[#allocation3 + $0x48] sm:$0xff] %vm387_vm0, %v1681_v16 }
  0x3c   : > { %398 = vst.msk [vmem:[#allocation3 + $0x50] sm:$0xff] %vm387_vm0, %v1681_v16  ;;  %399 = vst.msk [vmem:[#allocation3 + $0x58] sm:$0xff] %vm387_vm0, %v1681_v16 }
  0x3d   : > { %400 = vst.msk [vmem:[#allocation3 + $0x60] sm:$0xff] %vm387_vm0, %v1681_v16  ;;  %401 = vst.msk [vmem:[#allocation3 + $0x68] sm:$0xff] %vm387_vm0, %v1681_v16 }
  0x3e   : > { %402 = vst.msk [vmem:[#allocation3 + $0x70] sm:$0xff] %vm387_vm0, %v1681_v16  ;;  %403 = vst.msk [vmem:[#allocation3 + $0x78] sm:$0xff] %vm387_vm0, %v1681_v16 }
  0x3f PF: > { %s1343_s21 = sshll.u32 %s1663_s20, 7  ;;  %v404_v17 = vld [vmem:[%s1812_s14] sm:$0xff]   ;;  %v1835_v19 = vld [vmem:[%s1812_s14 + $0x8] sm:$0xff]   ;;  %v1847_v26 = vld [vmem:[%s1812_s14 + $0x10] sm:$0xff]   ;;  %vm762_vm1 = vcmask 7168   ;;  %p1361_p13 = scmp.ne.s32.totalorder %s1663_s20, 1 }
  0x40   : > { %v412_v18 = vld [vmem:[%s1812_s14 + $0x20] sm:$0xff]   ;;  %s421_s15 = sshra.s32 %s1343_s21, 3  ;;  %v700_v20 = vunpack.c.l.bf16 %v1835_v19  ;;  %v698_v21 = vunpack.c.l.bf16 %v404_v17  ;;  %1421 = vmatprep.mubr.bf16.mxu0 %v404_v17  ;;  %v701_v24 = vunpack.c.h.bf16 %v1835_v19  ;;  %v699_v25 = vunpack.c.h.bf16 %v404_v17  ;;  %v410_v31 = vld [vmem:[%s1812_s14 + $0x18] sm:$0xff]   ;;  %v414_v38 = vld [vmem:[%s1812_s14 + $0x28] sm:$0xff]  }
  0x41   : > { %s1344_s16 = sshll.u32 %s421_s15, 2  ;;  %1429 = vmatprep.mubr.bf16.mxu1 %v412_v18  ;;  %v703_v28 = vunpack.c.h.bf16 %v1847_v26  ;;  %v702_v29 = vunpack.c.l.bf16 %v1847_v26  ;;  %v705_v32 = vunpack.c.h.bf16 %v410_v31  ;;  %v704_v33 = vunpack.c.l.bf16 %v410_v31  ;;  %v416_v42 = vld [vmem:[%s1812_s14 + $0x30] sm:$0xff]   ;;  %v418_v46 = vld [vmem:[%s1812_s14 + $0x38] sm:$0xff]   ;;  %v687_v61 = vld [vmem:[#allocation3 + $0x28] sm:$0xff] }
  0x42   : > { %s1841_s28 = scalar_lea.vmem %s1965_s1, %s1344_s16  ;;  %718 = vadd.xlane.f32.xlu1 %v700_v20  ;;  %714 = vadd.xlane.f32.xlu0 %v698_v21  ;;  %v707_v35 = vunpack.c.h.bf16 %v412_v18  ;;  %v706_v36 = vunpack.c.l.bf16 %v412_v18  ;;  %v709_v39 = vunpack.c.h.bf16 %v414_v38  ;;  %v708_v40 = vunpack.c.l.bf16 %v414_v38  ;;  %v684_v49 = vld [vmem:[#allocation3 + $0x10] sm:$0xff]  ;;  %v685_v55 = vld [vmem:[#allocation3 + $0x18] sm:$0xff]  ;;  %v686_v62 = vld [vmem:[#allocation3 + $0x20] sm:$0xff] }
  0x43   : > { %v1559_v22 = vld [vmem:[%s1841_s28] sm:$0xff]   ;;  %v1560_v23 = vld [vmem:[%s1841_s28 + $0x8] sm:$0xff]   ;;  %v1561_v27 = vld [vmem:[%s1841_s28 + $0x10] sm:$0xff]   ;;  %v711_v43 = vunpack.c.h.bf16 %v416_v42  ;;  %v710_v44 = vunpack.c.l.bf16 %v416_v42  ;;  %v713_v47 = vunpack.c.h.bf16 %v418_v46  ;;  %v712_v48 = vunpack.c.l.bf16 %v418_v46 }
  0x44   : > { %1405 = vmatprep.subr.bf16.mxu0 %v1559_v22  ;;  %1469 = vmatprep.subr.bf16.mxu1 %v1559_v22  ;;  %v1562_v30 = vld [vmem:[%s1841_s28 + $0x18] sm:$0xff]   ;;  %v1563_v34 = vld [vmem:[%s1841_s28 + $0x20] sm:$0xff]   ;;  %v1564_v37 = vld [vmem:[%s1841_s28 + $0x28] sm:$0xff]  }
  0x45   : > { %1406 = vmatpush3.bf16.msra.mxu0 %v1559_v22  ;;  %1477 = vmatpush3.bf16.msra.mxu1 %v1559_v22  ;;  %v1565_v41 = vld [vmem:[%s1841_s28 + $0x30] sm:$0xff]   ;;  %v1566_v45 = vld [vmem:[%s1841_s28 + $0x38] sm:$0xff]   ;;  %v691_v9 = vld [vmem:[#allocation3 + $0x48] sm:$0xff] }
  0x46   : > { %1407 = vmatprep.subr.bf16.mxu0 %v1560_v23  ;;  %1470 = vmatprep.subr.bf16.mxu1 %v1560_v23  ;;  %v682_v50 = vld [vmem:[#allocation3] sm:$0xff]  ;;  %v683_v56 = vld [vmem:[#allocation3 + $0x8] sm:$0xff]  ;;  %v689_v3 = vld [vmem:[#allocation3 + $0x38] sm:$0xff] }
  0x47   : > { %720 = vadd.xlane.f32.xlu1 %v701_v24  ;;  %716 = vadd.xlane.f32.xlu0 %v699_v25  ;;  %v688_v4 = vld [vmem:[#allocation3 + $0x30] sm:$0xff]  ;;  %v690_v10 = vld [vmem:[#allocation3 + $0x40] sm:$0xff]  ;;  %v693_v15 = vld [vmem:[#allocation3 + $0x58] sm:$0xff] }
  0x48   : > { %v692_v16 = vld [vmem:[#allocation3 + $0x50] sm:$0xff]  ;;  %v695_v21 = vld [vmem:[#allocation3 + $0x68] sm:$0xff]  ;;  %v694_v22 = vld [vmem:[#allocation3 + $0x60] sm:$0xff] }
  0x49   : > { %1408 = vmatpush3.bf16.msra.mxu0 %v1560_v23  ;;  %1478 = vmatpush3.bf16.msra.mxu1 %v1560_v23 }
  0x4a   : > { %1409 = vmatprep.subr.bf16.mxu0 %v1561_v27  ;;  %1471 = vmatprep.subr.bf16.mxu1 %v1561_v27 }
  0x4b   : > { %724 = vadd.xlane.f32.xlu1 %v703_v28  ;;  %722 = vadd.xlane.f32.xlu0 %v702_v29  ;;  %v696_v28 = vld [vmem:[#allocation3 + $0x70] sm:$0xff] }
  0x4d   : > { %1410 = vmatpush3.bf16.msra.mxu0 %v1561_v27  ;;  %1479 = vmatpush3.bf16.msra.mxu1 %v1561_v27  ;;  %v697_v27 = vld [vmem:[#allocation3 + $0x78] sm:$0xff] }
  0x4e   : > { %1411 = vmatprep.subr.bf16.mxu0 %v1562_v30  ;;  %1472 = vmatprep.subr.bf16.mxu1 %v1562_v30 }
  0x4f   : > { %728 = vadd.xlane.f32.xlu1 %v705_v32  ;;  %726 = vadd.xlane.f32.xlu0 %v704_v33  ;;  %v443_v33 = vld [vmem:[#allocation2 + $0x10] sm:$0xff] }
  0x51   : > { %1412 = vmatpush3.bf16.msra.mxu0 %v1562_v30  ;;  %1480 = vmatpush3.bf16.msra.mxu1 %v1562_v30 }
  0x52   : > { %1413 = vmatprep.subr.bf16.mxu0 %v1563_v34  ;;  %1473 = vmatprep.subr.bf16.mxu1 %v1563_v34 }
  0x53   : > { %732 = vadd.xlane.f32.xlu1 %v707_v35  ;;  %730 = vadd.xlane.f32.xlu0 %v706_v36  ;;  %v441_v35 = vld [vmem:[#allocation2] sm:$0xff] }
  0x54   : > { %v449_v36 = vld [vmem:[#allocation2 + $0x40] sm:$0xff] }
  0x55   : > { %1414 = vmatpush3.bf16.msra.mxu0 %v1563_v34  ;;  %1481 = vmatpush3.bf16.msra.mxu1 %v1563_v34  ;;  %v451_v34 = vld [vmem:[#allocation2 + $0x50] sm:$0xff] }
  0x56   : > { %1415 = vmatprep.subr.bf16.mxu0 %v1564_v37  ;;  %1474 = vmatprep.subr.bf16.mxu1 %v1564_v37 }
  0x57   : > { %736 = vadd.xlane.f32.xlu1 %v709_v39  ;;  %734 = vadd.xlane.f32.xlu0 %v708_v40  ;;  %v444_v39 = vld [vmem:[#allocation2 + $0x18] sm:$0xff] }
  0x58   : > { %v452_v40 = vld [vmem:[#allocation2 + $0x58] sm:$0xff] }
  0x59   : > { %1416 = vmatpush3.bf16.msra.mxu0 %v1564_v37  ;;  %1482 = vmatpush3.bf16.msra.mxu1 %v1564_v37 }
  0x5a   : > { %1417 = vmatprep.subr.bf16.mxu0 %v1565_v41  ;;  %1475 = vmatprep.subr.bf16.mxu1 %v1565_v41 }
  0x5b   : > { %740 = vadd.xlane.f32.xlu1 %v711_v43  ;;  %738 = vadd.xlane.f32.xlu0 %v710_v44 }
  0x5d   : > { %1418 = vmatpush3.bf16.msra.mxu0 %v1565_v41  ;;  %1483 = vmatpush3.bf16.msra.mxu1 %v1565_v41 }
  0x5e   : > { %1419 = vmatprep.subr.bf16.mxu0 %v1566_v45  ;;  %1476 = vmatprep.subr.bf16.mxu1 %v1566_v45 }
  0x5f   : > { %744 = vadd.xlane.f32.xlu1 %v713_v47  ;;  %742 = vadd.xlane.f32.xlu0 %v712_v48 }
  0x61   : > { %1420 = vmatpush3.bf16.msra.mxu0 %v1566_v45  ;;  %1484 = vmatpush3.bf16.msra.mxu1 %v1566_v45  ;;  %v450_v45 = vld [vmem:[#allocation2 + $0x48] sm:$0xff] }
  0x64   : > { %1422 = vmatmul.mubr.bf16.vlgmr.msra.gmra.mrb[0].mxu0 %v1835_v19  ;;  %1430 = vmatmul.mubr.bf16.vlgmr.msra.gmra.mrb[0].mxu1 %v414_v38 }
  0x65   : > { %1425 = vmatprep.mubr.bf16.mxu0 %v1847_v26  ;;  %1433 = vmatprep.mubr.bf16.mxu1 %v416_v42 }
  0x6c   : > { %1426 = vmatmul.mubr.bf16.gmra.mrb[4].mxu0 %v410_v31  ;;  %1434 = vmatmul.mubr.bf16.gmra.mrb[4].mxu1 %v418_v46  ;;  %v442_v46 = vld [vmem:[#allocation2 + $0x8] sm:$0xff] }
  0xcf   : > { %v719_v51 = vpop.xlane.xlu1 %718  ;;  %v715_v52 = vpop.xlane.xlu0 %714 }
  0xd0   : > { %v748_v53 = vadd.f32 %v719_v51, %v684_v49  ;;  %v746_v54 = vadd.f32 %v715_v52, %v682_v50 }
  0xd2   : > { %765 = vst.msk [vmem:[#allocation3 + $0x10] sm:$0xff] %vm762_vm1, %v748_v53  ;;  %763 = vst.msk [vmem:[#allocation3] sm:$0xff] %vm762_vm1, %v746_v54 }
  0xd4   : > { %v721_v57 = vpop.xlane.xlu1 %720  ;;  %v717_v58 = vpop.xlane.xlu0 %716 }
  0xd5   : > { %v749_v59 = vadd.f32 %v721_v57, %v685_v55  ;;  %v747_v60 = vadd.f32 %v717_v58, %v683_v56  ;;  %v447_v57 = vld [vmem:[#allocation2 + $0x30] sm:$0xff] }
  0xd6   : > { %v455_v58 = vld [vmem:[#allocation2 + $0x70] sm:$0xff] }
  0xd7   : > { %766 = vst.msk [vmem:[#allocation3 + $0x18] sm:$0xff] %vm762_vm1, %v749_v59  ;;  %764 = vst.msk [vmem:[#allocation3 + $0x8] sm:$0xff] %vm762_vm1, %v747_v60  ;;  %v445_v59 = vld [vmem:[#allocation2 + $0x20] sm:$0xff] }
  0xd8   : > { %v725_v63 = vpop.xlane.xlu1 %724  ;;  %v723_v0 = vpop.xlane.xlu0 %722  ;;  %v453_v60 = vld [vmem:[#allocation2 + $0x60] sm:$0xff] }
  0xd9   : > { %v751_v1 = vadd.f32 %v725_v63, %v687_v61  ;;  %v750_v2 = vadd.f32 %v723_v0, %v686_v62  ;;  %v448_v63 = vld [vmem:[#allocation2 + $0x38] sm:$0xff] }
  0xda   : > { %v456_v0 = vld [vmem:[#allocation2 + $0x78] sm:$0xff] }
  0xdb   : > { %768 = vst.msk [vmem:[#allocation3 + $0x28] sm:$0xff] %vm762_vm1, %v751_v1  ;;  %767 = vst.msk [vmem:[#allocation3 + $0x20] sm:$0xff] %vm762_vm1, %v750_v2 }
  0xdc   : > { %v729_v5 = vpop.xlane.xlu1 %728  ;;  %v727_v6 = vpop.xlane.xlu0 %726 }
  0xdd   : > { %v753_v7 = vadd.f32 %v729_v5, %v689_v3  ;;  %v752_v8 = vadd.f32 %v727_v6, %v688_v4  ;;  %v454_v5 = vld [vmem:[#allocation2 + $0x68] sm:$0xff] }
  0xde   : > { %v446_v6 = vld [vmem:[#allocation2 + $0x28] sm:$0xff] }
  0xdf   : > { %770 = vst.msk [vmem:[#allocation3 + $0x38] sm:$0xff] %vm762_vm1, %v753_v7  ;;  %769 = vst.msk [vmem:[#allocation3 + $0x30] sm:$0xff] %vm762_vm1, %v752_v8 }
  0xe0   : > { %v733_v11 = vpop.xlane.xlu1 %732  ;;  %v731_v12 = vpop.xlane.xlu0 %730 }
  0xe1   : > { %v755_v13 = vadd.f32 %v733_v11, %v691_v9  ;;  %v754_v14 = vadd.f32 %v731_v12, %v690_v10 }
  0xe3   : > { %772 = vst.msk [vmem:[#allocation3 + $0x48] sm:$0xff] %vm762_vm1, %v755_v13  ;;  %771 = vst.msk [vmem:[#allocation3 + $0x40] sm:$0xff] %vm762_vm1, %v754_v14 }
  0xe4   : > { %v737_v17 = vpop.xlane.xlu1 %736  ;;  %v735_v18 = vpop.xlane.xlu0 %734 }
  0xe5   : > { %v757_v19 = vadd.f32 %v737_v17, %v693_v15  ;;  %v756_v20 = vadd.f32 %v735_v18, %v692_v16  ;;  %v1585_v17 = vld [vmem:[%s1966_s2] sm:$0xff] (!%p1361_p13)   ;;  %v1586_v18 = vld [vmem:[%s1966_s2 + $0x8] sm:$0xff] (!%p1361_p13)  }
  0xe6   : > { %1437 = vmatprep.subr.bf16.mxu0 (!%p1361_p13), %v1585_v17  ;;  %1485 = vmatprep.subr.bf16.mxu1 (!%p1361_p13), %v1585_v17 }
  0xe7   : > { %774 = vst.msk [vmem:[#allocation3 + $0x58] sm:$0xff] %vm762_vm1, %v757_v19  ;;  %773 = vst.msk [vmem:[#allocation3 + $0x50] sm:$0xff] %vm762_vm1, %v756_v20  ;;  %v1682_v19 = vmov (!%p1361_p13), 0   ;;  %1438 = vmatpush3.bf16.msra.mxu0 (!%p1361_p13), %v1585_v17  ;;  %1493 = vmatpush3.bf16.msra.mxu1 (!%p1361_p13), %v1585_v17  ;;  %v1587_v20 = vld [vmem:[%s1966_s2 + $0x10] sm:$0xff] (!%p1361_p13)  }
  0xe8   : > { %v741_v23 = vpop.xlane.xlu1 %740  ;;  %v739_v24 = vpop.xlane.xlu0 %738  ;;  %1583 = vset.pattern.permute.xlu0 (!%p1361_p13), %v1682_v19  ;;  %1584 = vset.pattern.permute.xlu1 (!%p1361_p13), %v1682_v19 }
  0xe9   : > { %v759_v25 = vadd.f32 %v741_v23, %v695_v21  ;;  %v758_v26 = vadd.f32 %v739_v24, %v694_v22  ;;  %1439 = vmatprep.subr.bf16.mxu0 (!%p1361_p13), %v1586_v18  ;;  %1486 = vmatprep.subr.bf16.mxu1 (!%p1361_p13), %v1586_v18  ;;  %v1588_v21 = vld [vmem:[%s1966_s2 + $0x18] sm:$0xff] (!%p1361_p13)  }
  0xeb   : > { %776 = vst.msk [vmem:[#allocation3 + $0x68] sm:$0xff] %vm762_vm1, %v759_v25  ;;  %775 = vst.msk [vmem:[#allocation3 + $0x60] sm:$0xff] %vm762_vm1, %v758_v26  ;;  %1440 = vmatpush3.bf16.msra.mxu0 (!%p1361_p13), %v1586_v18  ;;  %1494 = vmatpush3.bf16.msra.mxu1 (!%p1361_p13), %v1586_v18 }
  0xec   : > { %v745_v29 = vpop.xlane.xlu1 %744  ;;  %v743_v30 = vpop.xlane.xlu0 %742  ;;  %1441 = vmatprep.subr.bf16.mxu0 (!%p1361_p13), %v1587_v20  ;;  %1487 = vmatprep.subr.bf16.mxu1 (!%p1361_p13), %v1587_v20 }
  0xed   : > { %v761_v31 = vadd.f32 %v745_v29, %v697_v27  ;;  %v760_v32 = vadd.f32 %v743_v30, %v696_v28  ;;  %v1589_v28 = vld [vmem:[%s1966_s2 + $0x20] sm:$0xff] (!%p1361_p13)   ;;  %v785_v30 = vld [vmem:[#allocation3 + $0x10] sm:$0xff] (!%p1361_p13) }
  0xee   : > { %v783_v29 = vld [vmem:[#allocation3] sm:$0xff] (!%p1361_p13) }
  0xef   : > { %778 = vst.msk [vmem:[#allocation3 + $0x78] sm:$0xff] %vm762_vm1, %v761_v31  ;;  %777 = vst.msk [vmem:[#allocation3 + $0x70] sm:$0xff] %vm762_vm1, %v760_v32  ;;  %1442 = vmatpush3.bf16.msra.mxu0 (!%p1361_p13), %v1587_v20  ;;  %1495 = vmatpush3.bf16.msra.mxu1 (!%p1361_p13), %v1587_v20  ;;  %v799_v31 = vmax.f32 (!%p1361_p13), %v783_v29, 1.0  ;;  %v801_v32 = vmax.f32 (!%p1361_p13), %v785_v30, 1.0 }
  0xf0   : > { %1443 = vmatprep.subr.bf16.mxu0 (!%p1361_p13), %v1588_v21  ;;  %1488 = vmatprep.subr.bf16.mxu1 (!%p1361_p13), %v1588_v21 }
  0xf1   : > { %1593 = vrsqrt.f32 (!%p1361_p13), %v799_v31 }
  0xf2   : > { %1595 = vrsqrt.f32 (!%p1361_p13), %v801_v32 }
  0xf3   : > { %1444 = vmatpush3.bf16.msra.mxu0 (!%p1361_p13), %v1588_v21  ;;  %1496 = vmatpush3.bf16.msra.mxu1 (!%p1361_p13), %v1588_v21 }
  0xf4   : > { %1445 = vmatprep.subr.bf16.mxu0 (!%p1361_p13), %v1589_v28  ;;  %1489 = vmatprep.subr.bf16.mxu1 (!%p1361_p13), %v1589_v28 }
  0xf6   : > { %v797_v18 = vld [vmem:[#allocation3 + $0x70] sm:$0xff] (!%p1361_p13)  ;;  %v798_v20 = vld [vmem:[#allocation3 + $0x78] sm:$0xff] (!%p1361_p13) }
  0xf7   : > { %1446 = vmatpush3.bf16.msra.mxu0 (!%p1361_p13), %v1589_v28  ;;  %1497 = vmatpush3.bf16.msra.mxu1 (!%p1361_p13), %v1589_v28 }
 0x137   : > { %v1423_v37 = vpop.f32.mrb[0].mxu0  ;;  %v1431_v38 = vpop.f32.mrb[0].mxu1 }
 0x138   : > { %v652_v41 = vadd.f32 %v1423_v37, %v443_v33  ;;  %v660_v42 = vadd.f32 %v1431_v38, %v451_v34  ;;  %v587_v43 = vpop.f32.mrb[1].mxu0  ;;  %v619_v44 = vpop.f32.mrb[1].mxu1  ;;  %v784_v33 = vld [vmem:[#allocation3 + $0x8] sm:$0xff] (!%p1361_p13)  ;;  %v786_v34 = vld [vmem:[#allocation3 + $0x18] sm:$0xff] (!%p1361_p13)  ;;  %v787_v38 = vld [vmem:[#allocation3 + $0x20] sm:$0xff] (!%p1361_p13) }
 0x139   : > { %v650_v47 = vadd.f32 %v587_v43, %v441_v35  ;;  %v658_v48 = vadd.f32 %v619_v44, %v449_v36  ;;  %v1424_v49 = vpop.f32.mrb[2].mxu0  ;;  %v1432_v50 = vpop.f32.mrb[2].mxu1  ;;  %v800_v35 = vmax.f32 (!%p1361_p13), %v784_v33, 1.0  ;;  %v1590_v36 = vld [vmem:[%s1966_s2 + $0x28] sm:$0xff] (!%p1361_p13)   ;;  %v802_v37 = vmax.f32 (!%p1361_p13), %v786_v34, 1.0  ;;  %v789_v43 = vld [vmem:[#allocation3 + $0x30] sm:$0xff] (!%p1361_p13) }
 0x13a   : > { %668 = vst [vmem:[#allocation2 + $0x10] sm:$0xff] %v652_v41  ;;  %676 = vst [vmem:[#allocation2 + $0x50] sm:$0xff] %v660_v42  ;;  %v653_v51 = vadd.f32 %v1424_v49, %v444_v39  ;;  %v661_v52 = vadd.f32 %v1432_v50, %v452_v40  ;;  %v622_v53 = vpop.f32.mrb[3].mxu1  ;;  %v590_v54 = vpop.f32.mrb[3].mxu0  ;;  %v788_v39 = vld [vmem:[#allocation3 + $0x28] sm:$0xff] (!%p1361_p13)  ;;  %v803_v40 = vmax.f32 (!%p1361_p13), %v787_v38, 1.0  ;;  %1447 = vmatprep.subr.bf16.mxu0 (!%p1361_p13), %v1590_v36  ;;  %1490 = vmatprep.subr.bf16.mxu1 (!%p1361_p13), %v1590_v36 }
 0x13b   : > { %666 = vst [vmem:[#allocation2] sm:$0xff] %v650_v47  ;;  %674 = vst [vmem:[#allocation2 + $0x40] sm:$0xff] %v658_v48  ;;  %v659_v55 = vadd.f32 %v622_v53, %v450_v45  ;;  %v651_v56 = vadd.f32 %v590_v54, %v442_v46  ;;  %1597 = vrsqrt.f32 (!%p1361_p13), %v800_v35  ;;  %v1591_v41 = vld [vmem:[%s1966_s2 + $0x30] sm:$0xff] (!%p1361_p13)   ;;  %v804_v42 = vmax.f32 (!%p1361_p13), %v788_v39, 1.0  ;;  %v790_v44 = vld [vmem:[#allocation3 + $0x38] sm:$0xff] (!%p1361_p13)  ;;  %1448 = vmatpush3.bf16.msra.mxu0 (!%p1361_p13), %v1590_v36  ;;  %v1594_v50 = vpop.eup (!%p1361_p13), %1593 }
 0x13c   : > { %669 = vst [vmem:[#allocation2 + $0x18] sm:$0xff] %v653_v51  ;;  %677 = vst [vmem:[#allocation2 + $0x58] sm:$0xff] %v661_v52  ;;  %1599 = vrsqrt.f32 (!%p1361_p13), %v802_v37  ;;  %1498 = vmatpush3.bf16.msra.mxu1 (!%p1361_p13), %v1590_v36  ;;  %v805_v45 = vmax.f32 (!%p1361_p13), %v789_v43, 1.0  ;;  %1449 = vmatprep.subr.bf16.mxu0 (!%p1361_p13), %v1591_v41  ;;  %v1592_v46 = vld [vmem:[%s1966_s2 + $0x38] sm:$0xff] (!%p1361_p13)   ;;  %v806_v47 = vmax.f32 (!%p1361_p13), %v790_v44, 1.0  ;;  %v791_v48 = vld [vmem:[#allocation3 + $0x40] sm:$0xff] (!%p1361_p13)  ;;  %v1596_v54 = vpop.eup (!%p1361_p13), %1595 }
 0x13d   : > { %675 = vst [vmem:[#allocation2 + $0x48] sm:$0xff] %v659_v55  ;;  %667 = vst [vmem:[#allocation2 + $0x8] sm:$0xff] %v651_v56  ;;  %1601 = vrsqrt.f32 (!%p1361_p13), %v803_v40  ;;  %1491 = vmatprep.subr.bf16.mxu1 (!%p1361_p13), %v1591_v41  ;;  %v792_v49 = vld [vmem:[#allocation3 + $0x48] sm:$0xff] (!%p1361_p13)  ;;  %1018 = vperm.xlu0 (!%p1361_p13), %1583, %v1594_v50  }
 0x13e   : > { %1603 = vrsqrt.f32 (!%p1361_p13), %v804_v42  ;;  %1028 = vperm.xlu1 (!%p1361_p13), %1584, %v1596_v54  }
 0x13f   : > { %v1427_v61 = vpop.f32.mrb[4].mxu0  ;;  %v1435_v62 = vpop.f32.mrb[4].mxu1  ;;  %782 = sbr.rel (%p1361_p13) target bundleno = 591 (0x24f), region = 81  ;;  %1450 = vmatpush3.bf16.msra.mxu0 (!%p1361_p13), %v1591_v41  ;;  %1605 = vrsqrt.f32 (!%p1361_p13), %v805_v45 }
 0x140   : > { %v656_v1 = vadd.f32 %v1427_v61, %v447_v57  ;;  %v664_v2 = vadd.f32 %v1435_v62, %v455_v58  ;;  %v603_v3 = vpop.f32.mrb[5].mxu0  ;;  %v635_v4 = vpop.f32.mrb[5].mxu1  ;;  %1499 = vmatpush3.bf16.msra.mxu1 (!%p1361_p13), %v1591_v41  ;;  %v807_v58 = vmax.f32 (!%p1361_p13), %v791_v48, 1.0  ;;  %1451 = vmatprep.subr.bf16.mxu0 (!%p1361_p13), %v1592_v46  ;;  %1607 = vrsqrt.f32 (!%p1361_p13), %v806_v47  ;;  %v793_v62 = vld [vmem:[#allocation3 + $0x50] sm:$0xff] (!%p1361_p13) }
 0x141   : > { %v654_v7 = vadd.f32 %v603_v3, %v445_v59  ;;  %v662_v8 = vadd.f32 %v635_v4, %v453_v60  ;;  %v1428_v9 = vpop.f32.mrb[6].mxu0  ;;  %v1436_v10 = vpop.f32.mrb[6].mxu1  ;;  %v833_v51 = vld [vmem:[#allocation2 + $0x10] sm:$0xff] (!%p1361_p13)  ;;  %1492 = vmatprep.subr.bf16.mxu1 (!%p1361_p13), %v1592_v46  ;;  %v808_v61 = vmax.f32 (!%p1361_p13), %v792_v49, 1.0 }
 0x142   : > { %672 = vst [vmem:[#allocation2 + $0x30] sm:$0xff] %v656_v1  ;;  %680 = vst [vmem:[#allocation2 + $0x70] sm:$0xff] %v664_v2  ;;  %v657_v11 = vadd.f32 %v1428_v9, %v448_v63  ;;  %v665_v12 = vadd.f32 %v1436_v10, %v456_v0  ;;  %v638_v13 = vpop.f32.mrb[7].mxu1  ;;  %v606_v14 = vpop.f32.mrb[7].mxu0  ;;  %v831_v22 = vld [vmem:[#allocation2] sm:$0xff] (!%p1361_p13)  ;;  %v841_v53 = vld [vmem:[#allocation2 + $0x50] sm:$0xff] (!%p1361_p13)  ;;  %1609 = vrsqrt.f32 (!%p1361_p13), %v807_v58 }
 0x143   : > { %670 = vst [vmem:[#allocation2 + $0x20] sm:$0xff] %v654_v7  ;;  %678 = vst [vmem:[#allocation2 + $0x60] sm:$0xff] %v662_v8  ;;  %v663_v15 = vadd.f32 %v638_v13, %v454_v5  ;;  %v655_v16 = vadd.f32 %v606_v14, %v446_v6  ;;  %v839_v24 = vld [vmem:[#allocation2 + $0x40] sm:$0xff] (!%p1361_p13)  ;;  %v834_v52 = vld [vmem:[#allocation2 + $0x18] sm:$0xff] (!%p1361_p13)  ;;  %1452 = vmatpush3.bf16.msra.mxu0 (!%p1361_p13), %v1592_v46  ;;  %v809_v6 = vmax.f32 (!%p1361_p13), %v793_v62, 1.0  ;;  %1611 = vrsqrt.f32 (!%p1361_p13), %v808_v61 }
 0x144   : > { %673 = vst [vmem:[#allocation2 + $0x38] sm:$0xff] %v657_v11  ;;  %681 = vst [vmem:[#allocation2 + $0x78] sm:$0xff] %v665_v12  ;;  %v832_v23 = vld [vmem:[#allocation2 + $0x8] sm:$0xff] (!%p1361_p13)  ;;  %v842_v55 = vld [vmem:[#allocation2 + $0x58] sm:$0xff] (!%p1361_p13)  ;;  %v848_v2 = vpack.c.bf16 (!%p1361_p13), %v834_v52, %v833_v51  ;;  %1500 = vmatpush3.bf16.msra.mxu1 (!%p1361_p13), %v1592_v46 }
 0x145   : > { %679 = vst [vmem:[#allocation2 + $0x68] sm:$0xff] %v663_v15  ;;  %671 = vst [vmem:[#allocation2 + $0x28] sm:$0xff] %v655_v16  ;;  %v847_v25 = vpack.c.bf16 (!%p1361_p13), %v832_v23, %v831_v22  ;;  %v840_v26 = vld [vmem:[#allocation2 + $0x48] sm:$0xff] (!%p1361_p13)  ;;  %v1598_v63 = vpop.eup (!%p1361_p13), %1597  ;;  %v794_v0 = vld [vmem:[#allocation3 + $0x58] sm:$0xff] (!%p1361_p13)  ;;  %v852_v3 = vpack.c.bf16 (!%p1361_p13), %v842_v55, %v841_v53  ;;  %1613 = vrsqrt.f32 (!%p1361_p13), %v809_v6 }
 0x146   : > { %v851_v27 = vpack.c.bf16 %v840_v26, %v839_v24  ;;  %v1600_v1 = vpop.eup %1599  ;;  %v810_v7 = vmax.f32 %v794_v0, 1.0  ;;  %v795_v8 = vld [vmem:[#allocation3 + $0x60] sm:$0xff]  ;;  %1023 = vperm.xlu0 %1583, %v1598_v63   ;;  %v796_v10 = vld [vmem:[#allocation3 + $0x68] sm:$0xff]  ;;  %v813_v24 = vmax.f32 %v797_v18, 1.0 }
 0x147   : > { %1453 = vmatprep.mubr.bf16.mxu0 %v847_v25  ;;  %v1602_v9 = vpop.eup %1601  ;;  %1033 = vperm.xlu1 %1584, %v1600_v1   ;;  %v811_v16 = vmax.f32 %v795_v8, 1.0  ;;  %v812_v17 = vmax.f32 %v796_v10, 1.0  ;;  %v814_v25 = vmax.f32 %v798_v20, 1.0 }
 0x148   : > { %1461 = vmatprep.mubr.bf16.mxu1 %v851_v27  ;;  %v1604_v11 = vpop.eup %1603  ;;  %1454 = vmatmul.mubr.bf16.vlgmr.msra.gmra.mrb[0].mxu0 %v848_v2  ;;  %1615 = vrsqrt.f32 %v810_v7 }
 0x149   : > { %1462 = vmatmul.mubr.bf16.vlgmr.msra.gmra.mrb[0].mxu1 %v852_v3  ;;  %v837_v12 = vld [vmem:[#allocation2 + $0x30] sm:$0xff]  ;;  %v1606_v19 = vpop.eup %1605  ;;  %1617 = vrsqrt.f32 %v811_v16 }
 0x14a   : > { %v835_v56 = vld [vmem:[#allocation2 + $0x20] sm:$0xff]  ;;  %v845_v14 = vld [vmem:[#allocation2 + $0x70] sm:$0xff]  ;;  %1038 = vperm.xlu0 %1583, %v1602_v9   ;;  %v1608_v21 = vpop.eup %1607  ;;  %1619 = vrsqrt.f32 %v812_v17 }
 0x14b   : > { %v843_v59 = vld [vmem:[#allocation2 + $0x60] sm:$0xff]  ;;  %v838_v13 = vld [vmem:[#allocation2 + $0x38] sm:$0xff]  ;;  %1043 = vperm.xlu1 %1584, %v1604_v11   ;;  %1621 = vrsqrt.f32 %v813_v24 }
 0x14c   : > { %v836_v57 = vld [vmem:[#allocation2 + $0x28] sm:$0xff]  ;;  %v846_v15 = vld [vmem:[#allocation2 + $0x78] sm:$0xff]  ;;  %v850_v22 = vpack.c.bf16 %v838_v13, %v837_v12  ;;  %v1610_v26 = vpop.eup %1609  ;;  %1623 = vrsqrt.f32 %v814_v25 }
 0x14d   : > { %v844_v60 = vld [vmem:[#allocation2 + $0x68] sm:$0xff]  ;;  %v849_v4 = vpack.c.bf16 %v836_v57, %v835_v56  ;;  %v854_v23 = vpack.c.bf16 %v846_v15, %v845_v14  ;;  %v1612_v27 = vpop.eup %1611 }
 0x14e   : > { %v853_v5 = vpack.c.bf16 %v844_v60, %v843_v59  ;;  %1048 = vperm.xlu0 %1583, %v1606_v19  }
 0x14f   : > { %1457 = vmatprep.mubr.bf16.mxu0 %v849_v4  ;;  %1053 = vperm.xlu1 %1584, %v1608_v21   ;;  %v1614_v28 = vpop.eup %1613 }
 0x150   : > { %1465 = vmatprep.mubr.bf16.mxu1 %v853_v5  ;;  %1458 = vmatmul.mubr.bf16.gmra.mrb[4].mxu0 %v850_v22 }
 0x151   : > { %1466 = vmatmul.mubr.bf16.gmra.mrb[4].mxu1 %v854_v23 }
 0x152   : > { %1058 = vperm.xlu0 %1583, %v1610_v26   ;;  %v1616_v29 = vpop.eup %1615 }
 0x153   : > { %1063 = vperm.xlu1 %1584, %v1612_v27   ;;  %v1618_v30 = vpop.eup %1617 }
 0x154   : > { %v1620_v31 = vpop.eup %1619 }
 0x155   : > { %v1622_v32 = vpop.eup %1621 }
 0x156   : > { %1068 = vperm.xlu0 %1583, %v1614_v28   ;;  %v1624_v33 = vpop.eup %1623 }
 0x157   : > { %1073 = vperm.xlu1 %1584, %v1616_v29  }
 0x15a   : > { %1078 = vperm.xlu0 %1583, %v1618_v30  }
 0x15b   : > { %1083 = vperm.xlu1 %1584, %v1620_v31  }
 0x15e   : > { %1088 = vperm.xlu0 %1583, %v1622_v32  }
 0x15f   : > { %1093 = vperm.xlu1 %1584, %v1624_v33  }
 0x1bc   : > { %v1019_v34 = vpop.permute.xlu0 %1018 }
 0x1bd   : > { %v1029_v35 = vpop.permute.xlu1 %1028 }
 0x1c5   : > { %v1024_v36 = vpop.permute.xlu0 %1023 }
 0x1c6   : > { %v1034_v37 = vpop.permute.xlu1 %1033 }
 0x1c9   : > { %v1039_v38 = vpop.permute.xlu0 %1038 }
 0x1ca   : > { %v1904_v39 = vpop.permute.xlu1 %1043 }
 0x1cd   : > { %v1049_v40 = vpop.permute.xlu0 %1048 }
 0x1ce   : > { %v1054_v41 = vpop.permute.xlu1 %1053 }
 0x1d1   : > { %v1059_v42 = vpop.permute.xlu0 %1058 }
 0x1d2   : > { %v1064_v43 = vpop.permute.xlu1 %1063 }
 0x1d5   : > { %v1069_v44 = vpop.permute.xlu0 %1068 }
 0x1d6   : > { %v1074_v45 = vpop.permute.xlu1 %1073 }
 0x1d9   : > { %v1079_v46 = vpop.permute.xlu0 %1078 }
 0x1da   : > { %v1084_v47 = vpop.permute.xlu1 %1083 }
 0x1dd   : > { %v1089_v3 = vpop.permute.xlu0 %1088 }
 0x1de   : > { %v1094_v4 = vpop.permute.xlu1 %1093 }
 0x21b   : > { %v1455_v48 = vpop.f32.mrb[0].mxu0 }
 0x21c   : > { %v1463_v49 = vpop.f32.mrb[0].mxu1  ;;  %v1098_v50 = vmul.f32 %v1455_v48, %v1029_v35  ;;  %v953_v52 = vpop.f32.mrb[1].mxu0 }
 0x21d   : > { %v1906_v51 = vmul.f32 %v1463_v49, %v1069_v44  ;;  %v985_v53 = vpop.f32.mrb[1].mxu1  ;;  %v1096_v54 = vmul.f32 %v1019_v34, %v953_v52  ;;  %v1456_v56 = vpop.f32.mrb[2].mxu0 }
 0x21e   : > { %v1908_v55 = vmul.f32 %v1059_v42, %v985_v53  ;;  %v1464_v57 = vpop.f32.mrb[2].mxu1  ;;  %1114 = vst [vmem:[%s1800_s7 + $0x10] sm:$0xff] %v1098_v50  ;;  %v1099_v58 = vmul.f32 %v1456_v56, %v1034_v37  ;;  %v956_v60 = vpop.f32.mrb[3].mxu0  ;;  %v1151_v5 = vmul.f32 %v1098_v50, %v1098_v50 }
 0x21f   : > { %1122 = vst [vmem:[%s1800_s7 + $0x50] sm:$0xff] %v1906_v51  ;;  %v1913_v59 = vmul.f32 %v1464_v57, %v1074_v45  ;;  %v988_v61 = vpop.f32.mrb[3].mxu1  ;;  %1112 = vst [vmem:[%s1800_s7] sm:$0xff] %v1096_v54  ;;  %v1097_v62 = vmul.f32 %v1024_v36, %v956_v60  ;;  %v1149_v0 = vmul.f32 %v1096_v54, %v1096_v54 }
 0x220   : > { %1120 = vst [vmem:[%s1800_s7 + $0x40] sm:$0xff] %v1908_v55  ;;  %v1105_v63 = vmul.f32 %v1064_v43, %v988_v61  ;;  %1115 = vst [vmem:[%s1800_s7 + $0x18] sm:$0xff] %v1099_v58  ;;  %v1152_v10 = vmul.f32 %v1099_v58, %v1099_v58  ;;  %v1159_v45 = vmul.f32 %v1906_v51, %v1906_v51 }
 0x221   : > { %1123 = vst [vmem:[%s1800_s7 + $0x58] sm:$0xff] %v1913_v59  ;;  %1113 = vst [vmem:[%s1800_s7 + $0x8] sm:$0xff] %v1097_v62  ;;  %v1128_v1 = vadd.f32 %v1097_v62, %v1096_v54  ;;  %v1150_v2 = vmul.f32 %v1097_v62, %v1097_v62  ;;  %v1160_v48 = vmul.f32 %v1913_v59, %v1913_v59 }
 0x222   : > { %1121 = vst [vmem:[%s1800_s7 + $0x48] sm:$0xff] %v1105_v63  ;;  %v1158_v43 = vmul.f32 %v1105_v63, %v1105_v63 }
 0x223   : > { %v1129_v6 = vadd.f32 %v1128_v1, %v1098_v50  ;;  %v1165_v7 = vadd.f32 %v1150_v2, %v1149_v0  ;;  %v1459_v8 = vpop.f32.mrb[4].mxu0 }
 0x224   : > { %v1467_v9 = vpop.f32.mrb[4].mxu1  ;;  %v1102_v11 = vmul.f32 %v1459_v8, %v1049_v40  ;;  %v969_v13 = vpop.f32.mrb[5].mxu0  ;;  %v1157_v40 = vmul.f32 %v1908_v55, %v1908_v55 }
 0x225   : > { %v1110_v12 = vmul.f32 %v1467_v9, %v1089_v3  ;;  %v1001_v14 = vpop.f32.mrb[5].mxu1  ;;  %v1166_v15 = vadd.f32 %v1165_v7, %v1151_v5  ;;  %v1100_v16 = vmul.f32 %v1039_v38, %v969_v13  ;;  %v1130_v17 = vadd.f32 %v1129_v6, %v1099_v58  ;;  %v1460_v19 = vpop.f32.mrb[6].mxu0 }
 0x226   : > { %v1108_v18 = vmul.f32 %v1079_v46, %v1001_v14  ;;  %v1468_v20 = vpop.f32.mrb[6].mxu1  ;;  %1118 = vst [vmem:[%s1800_s7 + $0x30] sm:$0xff] %v1102_v11  ;;  %v1103_v21 = vmul.f32 %v1460_v19, %v1054_v41  ;;  %v972_v23 = vpop.f32.mrb[7].mxu0  ;;  %v1155_v33 = vmul.f32 %v1102_v11, %v1102_v11 }
 0x227   : > { %1126 = vst [vmem:[%s1800_s7 + $0x70] sm:$0xff] %v1110_v12  ;;  %v1111_v22 = vmul.f32 %v1468_v20, %v1094_v4  ;;  %v1004_v24 = vpop.f32.mrb[7].mxu1  ;;  %1116 = vst [vmem:[%s1800_s7 + $0x20] sm:$0xff] %v1100_v16  ;;  %v1131_v25 = vadd.f32 %v1130_v17, %v1100_v16  ;;  %v1153_v26 = vmul.f32 %v1100_v16, %v1100_v16 }
 0x228   : > { %v1167_v27 = vadd.f32 %v1166_v15, %v1152_v10  ;;  %1124 = vst [vmem:[%s1800_s7 + $0x60] sm:$0xff] %v1108_v18  ;;  %1119 = vst [vmem:[%s1800_s7 + $0x38] sm:$0xff] %v1103_v21  ;;  %v1101_v28 = vmul.f32 %v1904_v39, %v972_v23  ;;  %v1109_v29 = vmul.f32 %v1084_v47, %v1004_v24 }
 0x229   : > { %1127 = vst [vmem:[%s1800_s7 + $0x78] sm:$0xff] %v1111_v22  ;;  %v1156_v36 = vmul.f32 %v1103_v21, %v1103_v21  ;;  %v1161_v52 = vmul.f32 %v1108_v18, %v1108_v18  ;;  %v1163_v58 = vmul.f32 %v1110_v12, %v1110_v12  ;;  %v1164_v62 = vmul.f32 %v1111_v22, %v1111_v22 }
 0x22a   : > { %v1168_v30 = vadd.f32 %v1167_v27, %v1153_v26  ;;  %1117 = vst [vmem:[%s1800_s7 + $0x28] sm:$0xff] %v1101_v28  ;;  %v1132_v31 = vadd.f32 %v1131_v25, %v1101_v28  ;;  %v1154_v32 = vmul.f32 %v1101_v28, %v1101_v28  ;;  %1125 = vst [vmem:[%s1800_s7 + $0x68] sm:$0xff] %v1109_v29 }
 0x22b   : > { %v1162_v56 = vmul.f32 %v1109_v29, %v1109_v29 }
 0x22c   : > { %v1133_v34 = vadd.f32 %v1132_v31, %v1102_v11  ;;  %v1169_v35 = vadd.f32 %v1168_v30, %v1154_v32 }
 0x22e   : > { %v1134_v37 = vadd.f32 %v1133_v34, %v1103_v21  ;;  %v1170_v38 = vadd.f32 %v1169_v35, %v1155_v33 }
 0x230   : > { %v1135_v41 = vadd.f32 %v1134_v37, %v1908_v55  ;;  %v1171_v42 = vadd.f32 %v1170_v38, %v1156_v36 }
 0x232   : > { %v1172_v39 = vadd.f32 %v1171_v42, %v1157_v40  ;;  %v1136_v44 = vadd.f32 %v1135_v41, %v1105_v63 }
 0x234   : > { %v1137_v46 = vadd.f32 %v1136_v44, %v1906_v51  ;;  %v1173_v47 = vadd.f32 %v1172_v39, %v1158_v43 }
 0x236   : > { %v1138_v49 = vadd.f32 %v1137_v46, %v1913_v59  ;;  %v1174_v50 = vadd.f32 %v1173_v47, %v1159_v45 }
 0x238   : > { %v1139_v53 = vadd.f32 %v1138_v49, %v1108_v18  ;;  %v1175_v54 = vadd.f32 %v1174_v50, %v1160_v48 }
 0x23a   : > { %v1140_v55 = vadd.f32 %v1139_v53, %v1109_v29  ;;  %v1176_v57 = vadd.f32 %v1175_v54, %v1161_v52 }
 0x23c   : > { %v1141_v60 = vadd.f32 %v1140_v55, %v1110_v12  ;;  %v1177_v61 = vadd.f32 %v1176_v57, %v1162_v56 }
 0x23e   : > { %v1142_v63 = vadd.f32 %v1141_v60, %v1111_v22  ;;  %v1178_v51 = vadd.f32 %v1177_v61, %v1163_v58 }
 0x240   : > { %v1143_v0 = vrot.slane %v1142_v63, 4  ;;  %v1179_v1 = vadd.f32 %v1178_v51, %v1164_v62 }
 0x242   : > { %v1144_v2 = vadd.f32 %v1143_v0, %v1142_v63  ;;  %v1180_v3 = vrot.slane %v1179_v1, 4 }
 0x244   : > { %v1145_v59 = vrot.slane %v1144_v2, 2  ;;  %v1181_v4 = vadd.f32 %v1180_v3, %v1179_v1 }
 0x246   : > { %v1146_v5 = vadd.f32 %v1145_v59, %v1144_v2  ;;  %v1182_v6 = vrot.slane %v1181_v4, 2 }
 0x248   : > { %v1147_v7 = vrot.slane %v1146_v5, 1  ;;  %v1183_v8 = vadd.f32 %v1182_v6, %v1181_v4 }
 0x24a   : > { %v1148_v9 = vadd.f32 %v1147_v7, %v1146_v5  ;;  %v1184_v10 = vrot.slane %v1183_v8, 1 }
 0x24c   : > { %v1185_v11 = vadd.f32 %v1184_v10, %v1183_v8  ;;  %1186 = vst [vmem:[%s1805_s11] sm:$0xff] %v1148_v9 }
 0x24e   : > { %1187 = vst [vmem:[%s1810_s13] sm:$0xff] %v1185_v11 }
 0x24f PF: > { %s16_s24 = sadd.s32 1, %s1679_s24   ;;  %s1970_s18 = smov %s1659_s19 }
 0x250   : > { %p13_p0 = scmp.ge.s32.totalorder %s16_s24, 6   ;;  %s1971_s19 = smov %s1764_s6 }
 0x251   : > { %s1972_s20 = smov %s1671_s22  ;;  %s1973_s21 = smov %s1675_s23 }
 0x252   : > { %s1974_s22 = smov %s1977_s25  ;;  %s1975_s23 = smov %s1981_s26 }
 0x253   :  { %15 = sbr.rel (!%p13_p0) target bundleno = 4 (0x4), region = 141 }

</bundles_post_ra>
